<compile_context>
chip_gen: v7x
topology: tpu7x:2x2x1
jax: 0.10.0
libtpu: 0.0.40
codegen_flags: <defaults>
</compile_context>

<pallas_src>
import math
from functools import partial

import jax
import jax.numpy as jnp
from jax import lax
from jax.experimental import pallas as pl
from jax.experimental.pallas import tpu as pltpu


# ----------------------------- Pallas kernel ------------------------------- #

def _layer_norm(x, w, b, eps=1e-5):
    # x: (R, D) f32, w/b: (1, D) f32
    mu = jnp.mean(x, axis=-1, keepdims=True)
    var = jnp.mean(jnp.square(x - mu), axis=-1, keepdims=True)
    return (x - mu) * lax.rsqrt(var + eps) * w + b


def fused_transformer_kernel(*refs, nhead, d_model, dim_ff, num_layers, has_fc, mm_dtype):
    if has_fc:
        (x_ref, pe_ref, mask_ref, wqkv_ref, wo_ref, w1_ref, w2_ref, pk_ref,
         wf_ref, bf_ref, o_ref, x_acc) = refs
    else:
        (x_ref, pe_ref, mask_ref, wqkv_ref, wo_ref, w1_ref, w2_ref, pk_ref,
         o_ref, x_acc) = refs
        wf_ref = bf_ref = None

    l = pl.program_id(1)
    D = d_model
    FF = dim_ff
    dh = D // nhead
    scale = 1.0 / math.sqrt(dh)

    @pl.when(l == 0)
    def _():
        # Positional encoding fused into the first layer (dropout = identity in eval).
        x_acc[...] = x_ref[...].astype(jnp.float32) + pe_ref[...]

    x = x_acc[...]                                  # (R, D) f32 carried activation
    mask_add = mask_ref[...]                        # (R, R) precomputed block-causal mask

    # Packed per-layer bias / LN params: one (8, Pmax) f32 tile, one param per row,
    # every param starting at lane 0 (cheap static slices).
    bqkv = pk_ref[0:1, 0:3 * D]
    bo   = pk_ref[1:2, 0:D]
    ln1w = pk_ref[2:3, 0:D]
    ln1b = pk_ref[3:4, 0:D]
    b1   = pk_ref[4:5, 0:FF]
    b2   = pk_ref[5:6, 0:D]
    ln2w = pk_ref[6:7, 0:D]
    ln2b = pk_ref[7:8, 0:D]

    x_mm = x.astype(mm_dtype)                       # bf16 operands for the MXU only

    # ---- fused QKV projection: one (R, D) x (D, 3D) matmul per layer.
    qkv = jnp.dot(x_mm, wqkv_ref[...], preferred_element_type=jnp.float32) + bqkv

    # ---- per-head attention: heads lane-sliced out of the fused QKV result.
    heads = []
    for h in range(nhead):                          # static unroll (nhead small)
        q = qkv[:, h * dh:(h + 1) * dh]
        k = qkv[:, D + h * dh:D + (h + 1) * dh]
        v = qkv[:, 2 * D + h * dh:2 * D + (h + 1) * dh]
        s = lax.dot_general(q.astype(mm_dtype), k.astype(mm_dtype),
                            dimension_numbers=(((1,), (1,)), ((), ())),
                            preferred_element_type=jnp.float32)          # (R, R)
        s = s * scale + mask_add                     # block-diagonal + causal (additive)
        m = jnp.max(s, axis=-1, keepdims=True)
        p = jnp.exp(s - m)
        p = p * pl.reciprocal(jnp.sum(p, axis=-1, keepdims=True), approx=True)
        heads.append(jnp.dot(p.astype(mm_dtype), v.astype(mm_dtype),
                             preferred_element_type=jnp.float32))         # (R, dh)

    # ---- single output projection: concat heads, one (R, D) x (D, D) matmul.
    attn = jnp.concatenate(heads, axis=-1)                                # (R, D) f32
    attn = jnp.dot(attn.astype(mm_dtype), wo_ref[...],
                   preferred_element_type=jnp.float32) + bo

    # residual + LayerNorm1 (post-norm), f32
    y = _layer_norm(x + attn, ln1w, ln1b)

    # feed-forward: Linear1 -> relu -> Linear2 (pre-transposed weights, bf16 operands)
    h1 = jnp.dot(y.astype(mm_dtype), w1_ref[...],
                 preferred_element_type=jnp.float32) + b1
    h1 = jnp.maximum(h1, 0.0)
    ff = jnp.dot(h1.astype(mm_dtype), w2_ref[...],
                 preferred_element_type=jnp.float32) + b2
    y = _layer_norm(y + ff, ln2w, ln2b)

    x_acc[...] = y                                   # carry to next layer (stays in VMEM)

    @pl.when(l == num_layers - 1)
    def _():
        if has_fc:
            out = jnp.dot(y.astype(mm_dtype), wf_ref[...],
                          preferred_element_type=jnp.float32) + bf_ref[...]
        else:
            out = y
        o_ref[...] = out.astype(o_ref.dtype)


# ----------------------------- pallas_call wrapper -------------------------- #

def _make_block_causal_mask(tb, s):
    """Additive mask for Tb batch elements flattened into Tb*S rows:
    -inf across different batch elements, -inf above the diagonal within each."""
    r = tb * s
    idx = jnp.arange(r)
    same_batch = (idx[:, None] // s) == (idx[None, :] // s)
    causal_ok = (idx[None, :] % s) <= (idx[:, None] % s)
    return jnp.where(same_batch & causal_ok, 0.0, -jnp.inf).astype(jnp.float32)


def fused_transformer(x_bsd, prep, *, nhead, batch_tile=None, mm_dtype=jnp.bfloat16,
                      vmem_limit_bytes=48 * 1024 * 1024):
    B, S, D = x_bsd.shape
    L = prep["wqkv"].shape[0]
    FF = prep["w1"].shape[2]
    Pmax = prep["pk"].shape[2]
    has_fc = prep["wf"] is not None
    O = prep["wf"].shape[1] if has_fc else D

    # Pick a batch tile giving ~128 rows per grid step (full MXU sublane fill).
    # On v7x, larger B naturally yields >=2 parallel programs to feed both TensorCores.
    if batch_tile is None:
        batch_tile = max(1, min(B, max(1, 128 // S)))
    Tb = batch_tile
    nb = -(-B // Tb)
    Bp = nb * Tb
    if Bp != B:                                     # pad batch; padded rows are self-contained
        x_bsd = jnp.concatenate(
            [x_bsd, jnp.zeros((Bp - B, S, D), x_bsd.dtype)], axis=0)

    R = Tb * S
    x_rows = x_bsd.reshape(Bp * S, D)               # host-side flatten (lane-dense 2D blocks)
    pe_tiled = jnp.tile(prep["pe"], (Tb, 1))        # (R, D), one PE copy per batch element
    mask_add = _make_block_causal_mask(Tb, S)       # (R, R)

    def bcast2(shape):
        return pl.BlockSpec(shape, lambda b, l: (0, 0))

    def per_layer(shape):                           # stacked (L, ...): squeeze layer dim
        return pl.BlockSpec((None,) + tuple(shape[1:]), lambda b, l: (l, 0, 0))

    in_specs = [
        pl.BlockSpec((R, D), lambda b, l: (b, 0)),  # x rows (one batch tile)
        bcast2((R, D)),                             # tiled positional encoding
        bcast2((R, R)),                             # block-causal additive mask
        per_layer((L, D, 3 * D)),                   # fused Wqkv (in, out)
        per_layer((L, D, D)),                       # Wo (in, out)
        per_layer((L, D, FF)),                      # W1
        per_layer((L, FF, D)),                      # W2
        per_layer((L, 8, Pmax)),                    # packed biases + LN params (1 DMA)
    ]
    args = [x_rows, pe_tiled, mask_add,
            prep["wqkv"], prep["wo"], prep["w1"], prep["w2"], prep["pk"]]
    if has_fc:
        in_specs += [bcast2((D, O)), bcast2((1, O))]
        args += [prep["wf"], prep["bf"]]

    kernel = partial(fused_transformer_kernel, nhead=nhead, d_model=D, dim_ff=FF,
                     num_layers=L, has_fc=has_fc, mm_dtype=mm_dtype)
    out = pl.pallas_call(
        kernel,
        out_shape=jax.ShapeDtypeStruct((Bp * S, O), x_bsd.dtype),
        grid=(nb, L),                               # layer axis last (carried state)
        in_specs=in_specs,
        out_specs=pl.BlockSpec((R, O), lambda b, l: (b, 0)),
        scratch_shapes=[pltpu.VMEM((R, D), jnp.float32)],   # activation carried across layers
        compiler_params=pltpu.CompilerParams(
            dimension_semantics=("parallel", "arbitrary"),
            vmem_limit_bytes=vmem_limit_bytes),
    )(*args)
    return out.reshape(Bp, S, O)[:B]


# ----------------------------- host-side weight prep ------------------------ #

def make_pe(seq_len, d_model, dtype=jnp.float32):
    pos = jnp.arange(seq_len, dtype=jnp.float32)[:, None]
    div = jnp.exp(jnp.arange(0, d_model, 2, dtype=jnp.float32)
                  * (-math.log(10000.0) / d_model))
    pe = jnp.zeros((seq_len, d_model), jnp.float32)
    pe = pe.at[:, 0::2].set(jnp.sin(pos * div))
    pe = pe.at[:, 1::2].set(jnp.cos(pos * div))
    return pe.astype(dtype)


def prepare_params(params, seq_len, nhead, mm_dtype=jnp.bfloat16):
    """One-time wrapper-side prep: transpose weights to (in, out), stack over layers,
    cast matmul operands to mm_dtype, and pack the tiny bias/LN vectors into one tensor."""
    layers = params["layers"]
    D = layers[0]["wo"].shape[0]
    FF = layers[0]["w1"].shape[0]
    Pmax = max(3 * D, FF)

    wqkv, wo, w1, w2, pk = [], [], [], [], []
    for p in layers:
        wqkv.append(p["wqkv"].T)                    # (D, 3D) [in, out]; q|k|v column blocks
        wo.append(p["wo"].T)                        # (D, D)
        w1.append(p["w1"].T)                        # (D, FF)
        w2.append(p["w2"].T)                        # (FF, D)
        rows = [p["bqkv"][0], p["bo"][0], p["ln1w"][0], p["ln1b"][0],
                p["b1"][0], p["b2"][0], p["ln2w"][0], p["ln2b"][0]]
        pk.append(jnp.stack(
            [jnp.pad(r, (0, Pmax - r.shape[0])) for r in rows], 0))      # (8, Pmax)

    prep = dict(
        pe=make_pe(seq_len, D),
        wqkv=jnp.stack(wqkv, 0).astype(mm_dtype),
        wo=jnp.stack(wo, 0).astype(mm_dtype),
        w1=jnp.stack(w1, 0).astype(mm_dtype),
        w2=jnp.stack(w2, 0).astype(mm_dtype),
        pk=jnp.stack(pk, 0).astype(jnp.float32),
        wf=None, bf=None)
    if params["fc"] is not None:
        prep["wf"] = params["fc"]["w"].T.astype(mm_dtype)
        prep["bf"] = params["fc"]["b"].astype(jnp.float32)
    return prep


def init_params(key, d_model, nhead, num_layers, dim_ff, dim_output):
    def dense(k, out_f, in_f):
        return (jax.random.normal(k, (out_f, in_f), jnp.float32)
                * (1.0 / math.sqrt(in_f)))

    layers = []
    for li in range(num_layers):
        ks = jax.random.split(jax.random.fold_in(key, li), 4)
        layers.append(dict(
            wqkv=dense(ks[0], 3 * d_model, d_model),
            bqkv=jnp.zeros((1, 3 * d_model), jnp.float32),
            wo=dense(ks[1], d_model, d_model),
            bo=jnp.zeros((1, d_model), jnp.float32),
            ln1w=jnp.ones((1, d_model), jnp.float32),
            ln1b=jnp.zeros((1, d_model), jnp.float32),
            w1=dense(ks[2], dim_ff, d_model),
            b1=jnp.zeros((1, dim_ff), jnp.float32),
            w2=dense(ks[3], d_model, dim_ff),
            b2=jnp.zeros((1, d_model), jnp.float32),
            ln2w=jnp.ones((1, d_model), jnp.float32),
            ln2b=jnp.zeros((1, d_model), jnp.float32),
        ))
    fc = None
    if dim_output != d_model:
        kf = jax.random.fold_in(key, 1000)
        fc = dict(w=dense(kf, dim_output, d_model),
                  b=jnp.zeros((1, dim_output), jnp.float32))
    return dict(layers=layers, fc=fc)


def transformer_model(src_sbd, params, nhead, mm_dtype=jnp.bfloat16):
    """src_sbd: [seq, batch, d_model] (PyTorch layout). Returns [seq, batch, dim_output]."""
    S, B, D = src_sbd.shape
    x = jnp.transpose(src_sbd, (1, 0, 2))           # -> [B, S, D] kernel layout
    prep = prepare_params(params, S, nhead, mm_dtype)
    out = fused_transformer(x, prep, nhead=nhead, mm_dtype=mm_dtype)
    return jnp.transpose(out, (1, 0, 2))


# ----------------------------- pure-JAX reference --------------------------- #
# Same matmul dtype policy (bf16 operands, f32 accumulation; f32 softmax/LN) so the
# comparison isolates kernel bugs rather than bf16 quantization noise.

def reference_model(src_sbd, params, nhead, mm_dtype=jnp.bfloat16):
    S, B, D = src_sbd.shape
    dh = D // nhead

    def mm(a, w):
        return jnp.dot(a.astype(mm_dtype), w.astype(mm_dtype),
                       preferred_element_type=jnp.float32)

    def ln(y, w, b, eps=1e-5):
        mu = jnp.mean(y, -1, keepdims=True)
        var = jnp.mean(jnp.square(y - mu), -1, keepdims=True)
        return (y - mu) * lax.rsqrt(var + eps) * w + b

    x = jnp.transpose(src_sbd, (1, 0, 2)).astype(jnp.float32)
    x = x + make_pe(S, D)[None]
    causal = jnp.arange(S)[None, :] > jnp.arange(S)[:, None]
    for p in params["layers"]:
        qkv = mm(x, p["wqkv"].T) + p["bqkv"]
        q, k, v = qkv[..., :D], qkv[..., D:2 * D], qkv[..., 2 * D:]
        qh = q.reshape(B, S, nhead, dh).transpose(0, 2, 1, 3)
        kh = k.reshape(B, S, nhead, dh).transpose(0, 2, 1, 3)
        vh = v.reshape(B, S, nhead, dh).transpose(0, 2, 1, 3)
        s = jnp.einsum("bhqd,bhkd->bhqk", qh.astype(mm_dtype), kh.astype(mm_dtype),
                       preferred_element_type=jnp.float32) / math.sqrt(dh)
        s = jnp.where(causal[None, None], -jnp.inf, s)
        pm = jax.nn.softmax(s, axis=-1)
        a = jnp.einsum("bhqk,bhkd->bhqd", pm.astype(mm_dtype), vh.astype(mm_dtype),
                       preferred_element_type=jnp.float32)
        a = a.transpose(0, 2, 1, 3).reshape(B, S, D)
        a = mm(a, p["wo"].T) + p["bo"]
        x = ln(x + a, p["ln1w"], p["ln1b"])
        h1 = jnp.maximum(mm(x, p["w1"].T) + p["b1"], 0.0)
        ff = mm(h1, p["w2"].T) + p["b2"]
        x = ln(x + ff, p["ln2w"], p["ln2b"])
    if params["fc"] is not None:
        x = mm(x, params["fc"]["w"].T) + params["fc"]["b"]
    return jnp.transpose(x, (1, 0, 2))


# ----------------------------- main ------------------------------------------ #

if __name__ == "__main__":
    S, B = 8, 2
    d_model, nhead, num_layers, dim_ff, dim_output = 32, 4, 2, 64, 16

    key = jax.random.PRNGKey(0)
    k_src, k_par = jax.random.split(key)
    src = jax.random.normal(k_src, (S, B, d_model), jnp.float32)  # [seq, batch, d_model]
    params = init_params(k_par, d_model, nhead, num_layers, dim_ff, dim_output)

    out = jax.block_until_ready(transformer_model(src, params, nhead))
    ref = jax.block_until_ready(reference_model(src, params, nhead))

    assert out.shape == (S, B, dim_output), out.shape
    # Tolerance covers bf16 MXU operands + approx softmax reciprocal (both impls
    # share the bf16 policy, so the residual difference is well below this bound).
    max_err = float(jnp.max(jnp.abs(out - ref)))
    assert jnp.allclose(out, ref, atol=5e-2, rtol=5e-2), max_err

    print("KERNEL_OK")
</pallas_src>

<mosaic_0001>
module attributes {stable_mosaic.version = 11 : i64} {
  func.func @fused_transformer_kernel(%arg0: i32, %arg1: i32, %arg2: memref<16x32xf32, #tpu.memory_space<vmem>>, %arg3: memref<16x32xf32, #tpu.memory_space<vmem>>, %arg4: memref<16x16xf32, #tpu.memory_space<vmem>>, %arg5: memref<1x32x96xbf16, #tpu.memory_space<vmem>>, %arg6: memref<1x32x32xbf16, #tpu.memory_space<vmem>>, %arg7: memref<1x32x64xbf16, #tpu.memory_space<vmem>>, %arg8: memref<1x64x32xbf16, #tpu.memory_space<vmem>>, %arg9: memref<1x8x96xf32, #tpu.memory_space<vmem>>, %arg10: memref<32x16xbf16, #tpu.memory_space<vmem>>, %arg11: memref<1x16xf32, #tpu.memory_space<vmem>>, %arg12: memref<16x16xf32, #tpu.memory_space<vmem>>, %arg13: memref<16x32xf32, #tpu.memory_space<vmem>>) attributes {dimension_semantics = [#tpu.dimension_semantics<parallel>, #tpu.dimension_semantics<arbitrary>], iteration_bounds = array<i64: 1, 2>, scalar_prefetch = 0 : i64, scratch_operands = 1 : i64, tpu.core_type = #tpu.core_type<tc>, window_params = [{transform_indices = @transform_0, window_bounds = array<i64: 16, 32>}, {pipeline_mode = #tpu.pipeline_mode<synchronous>, transform_indices = @transform_1, window_bounds = array<i64: 16, 32>}, {pipeline_mode = #tpu.pipeline_mode<synchronous>, transform_indices = @transform_2, window_bounds = array<i64: 16, 16>}, {transform_indices = @transform_3, window_bounds = array<i64: 1, 32, 96>}, {transform_indices = @transform_4, window_bounds = array<i64: 1, 32, 32>}, {transform_indices = @transform_5, window_bounds = array<i64: 1, 32, 64>}, {transform_indices = @transform_6, window_bounds = array<i64: 1, 64, 32>}, {transform_indices = @transform_7, window_bounds = array<i64: 1, 8, 96>}, {pipeline_mode = #tpu.pipeline_mode<synchronous>, transform_indices = @transform_8, window_bounds = array<i64: 32, 16>}, {pipeline_mode = #tpu.pipeline_mode<synchronous>, transform_indices = @transform_9, window_bounds = array<i64: 1, 16>}, {transform_indices = @transform_10, window_bounds = array<i64: 16, 16>}]} {
    %c0_i32 = arith.constant 0 : i32
    %0 = arith.cmpi eq, %arg1, %c0_i32 : i32
    %1 = arith.extui %0 : i1 to i32
    %c0_i32_0 = arith.constant 0 : i32
    %2 = arith.cmpi ne, %1, %c0_i32_0 : i32
    scf.if %2 {
      %c0_70 = arith.constant 0 : index
      %c0_71 = arith.constant 0 : index
      %186 = vector.load %arg2[%c0_70, %c0_71] : memref<16x32xf32, #tpu.memory_space<vmem>>, vector<16x32xf32>
      %c0_72 = arith.constant 0 : index
      %c0_73 = arith.constant 0 : index
      %187 = vector.load %arg3[%c0_72, %c0_73] : memref<16x32xf32, #tpu.memory_space<vmem>>, vector<16x32xf32>
      %188 = arith.addf %186, %187 : vector<16x32xf32>
      %c0_74 = arith.constant 0 : index
      %c0_75 = arith.constant 0 : index
      %189 = vector.load %arg13[%c0_74, %c0_75] : memref<16x32xf32, #tpu.memory_space<vmem>>, vector<16x32xf32>
      tpu.vector_store %arg13[%c0_74, %c0_75], %188 {strides = array<i32>} : memref<16x32xf32, #tpu.memory_space<vmem>>, vector<16x32xf32>,
    } else {
    }
    %c0 = arith.constant 0 : index
    %c0_1 = arith.constant 0 : index
    %3 = vector.load %arg13[%c0, %c0_1] : memref<16x32xf32, #tpu.memory_space<vmem>>, vector<16x32xf32>
    %c0_2 = arith.constant 0 : index
    %c0_3 = arith.constant 0 : index
    %4 = vector.load %arg4[%c0_2, %c0_3] : memref<16x16xf32, #tpu.memory_space<vmem>>, vector<16x16xf32>
    %c0_4 = arith.constant 0 : index
    %c0_5 = arith.constant 0 : index
    %c0_6 = arith.constant 0 : index
    %5 = vector.load %arg9[%c0_4, %c0_5, %c0_6] : memref<1x8x96xf32, #tpu.memory_space<vmem>>, vector<1x1x96xf32>
    %6 = vector.shape_cast %5 : vector<1x1x96xf32> to vector<1x96xf32>
    %c0_7 = arith.constant 0 : index
    %c1 = arith.constant 1 : index
    %c0_8 = arith.constant 0 : index
    %7 = vector.load %arg9[%c0_7, %c1, %c0_8] : memref<1x8x96xf32, #tpu.memory_space<vmem>>, vector<1x1x32xf32>
    %8 = vector.shape_cast %7 : vector<1x1x32xf32> to vector<1x32xf32>
    %c0_9 = arith.constant 0 : index
    %c2 = arith.constant 2 : index
    %c0_10 = arith.constant 0 : index
    %9 = vector.load %arg9[%c0_9, %c2, %c0_10] : memref<1x8x96xf32, #tpu.memory_space<vmem>>, vector<1x1x32xf32>
    %10 = vector.shape_cast %9 : vector<1x1x32xf32> to vector<1x32xf32>
    %c0_11 = arith.constant 0 : index
    %c3 = arith.constant 3 : index
    %c0_12 = arith.constant 0 : index
    %11 = vector.load %arg9[%c0_11, %c3, %c0_12] : memref<1x8x96xf32, #tpu.memory_space<vmem>>, vector<1x1x32xf32>
    %12 = vector.shape_cast %11 : vector<1x1x32xf32> to vector<1x32xf32>
    %c0_13 = arith.constant 0 : index
    %c4 = arith.constant 4 : index
    %c0_14 = arith.constant 0 : index
    %13 = vector.load %arg9[%c0_13, %c4, %c0_14] : memref<1x8x96xf32, #tpu.memory_space<vmem>>, vector<1x1x64xf32>
    %14 = vector.shape_cast %13 : vector<1x1x64xf32> to vector<1x64xf32>
    %c0_15 = arith.constant 0 : index
    %c5 = arith.constant 5 : index
    %c0_16 = arith.constant 0 : index
    %15 = vector.load %arg9[%c0_15, %c5, %c0_16] : memref<1x8x96xf32, #tpu.memory_space<vmem>>, vector<1x1x32xf32>
    %16 = vector.shape_cast %15 : vector<1x1x32xf32> to vector<1x32xf32>
    %c0_17 = arith.constant 0 : index
    %c6 = arith.constant 6 : index
    %c0_18 = arith.constant 0 : index
    %17 = vector.load %arg9[%c0_17, %c6, %c0_18] : memref<1x8x96xf32, #tpu.memory_space<vmem>>, vector<1x1x32xf32>
    %18 = vector.shape_cast %17 : vector<1x1x32xf32> to vector<1x32xf32>
    %c0_19 = arith.constant 0 : index
    %c7 = arith.constant 7 : index
    %c0_20 = arith.constant 0 : index
    %19 = vector.load %arg9[%c0_19, %c7, %c0_20] : memref<1x8x96xf32, #tpu.memory_space<vmem>>, vector<1x1x32xf32>
    %20 = vector.shape_cast %19 : vector<1x1x32xf32> to vector<1x32xf32>
    %21 = arith.truncf %3 : vector<16x32xf32> to vector<16x32xbf16>
    %c0_21 = arith.constant 0 : index
    %c0_22 = arith.constant 0 : index
    %c0_23 = arith.constant 0 : index
    %22 = vector.load %arg5[%c0_21, %c0_22, %c0_23] : memref<1x32x96xbf16, #tpu.memory_space<vmem>>, vector<1x32x96xbf16>
    %23 = vector.shape_cast %22 : vector<1x32x96xbf16> to vector<32x96xbf16>
    %cst = arith.constant dense<0.000000e+00> : vector<16x96xf32>
    %24 = tpu.matmul %21, %23, %cst {dimension_numbers = #tpu.dot_dimension_numbers<[1], [0], [0], [1], [0, 0, 1, 1], [], []>} : vector<16x32xbf16>, vector<32x96xbf16>, vector<16x96xf32> -> vector<16x96xf32>
    %25 = vector.broadcast %6 : vector<1x96xf32> to vector<16x96xf32>
    %26 = arith.addf %24, %25 : vector<16x96xf32>
    %27 = vector.extract_strided_slice %26 {offsets = [0, 0], sizes = [16, 8], strides = [1, 1]} : vector<16x96xf32> to vector<16x8xf32>
    %28 = vector.extract_strided_slice %26 {offsets = [0, 32], sizes = [16, 8], strides = [1, 1]} : vector<16x96xf32> to vector<16x8xf32>
    %29 = vector.extract_strided_slice %26 {offsets = [0, 64], sizes = [16, 8], strides = [1, 1]} : vector<16x96xf32> to vector<16x8xf32>
    %30 = arith.truncf %27 : vector<16x8xf32> to vector<16x8xbf16>
    %31 = arith.truncf %28 : vector<16x8xf32> to vector<16x8xbf16>
    %cst_24 = arith.constant dense<0.000000e+00> : vector<16x16xf32>
    %32 = tpu.matmul %30, %31, %cst_24 {dimension_numbers = #tpu.dot_dimension_numbers<[1], [1], [0], [0], [0, 0, 1, 0], [], []>} : vector<16x8xbf16>, vector<16x8xbf16>, vector<16x16xf32> -> vector<16x16xf32>
    %cst_25 = arith.constant 0.353553385 : f32
    %33 = vector.broadcast %cst_25 : f32 to vector<16x16xf32>
    %34 = arith.mulf %32, %33 : vector<16x16xf32>
    %35 = arith.addf %34, %4 : vector<16x16xf32>
    %cst_26 = arith.constant dense<0xFF800000> : vector<16xf32>
    %36 = vector.multi_reduction <maximumf>, %35, %cst_26 [1] : vector<16x16xf32> to vector<16xf32>
    %37 = vector.shape_cast %36 : vector<16xf32> to vector<16x1xf32>
    %38 = vector.broadcast %37 : vector<16x1xf32> to vector<16x16xf32>
    %39 = arith.subf %35, %38 : vector<16x16xf32>
    %40 = math.exp %39 : vector<16x16xf32>
    %cst_27 = arith.constant dense<0.000000e+00> : vector<16xf32>
    %41 = vector.multi_reduction <add>, %40, %cst_27 [1] : vector<16x16xf32> to vector<16xf32>
    %42 = vector.shape_cast %41 : vector<16xf32> to vector<16x1xf32>
    %43 = tpu.reciprocal %42 {approx = true} : vector<16x1xf32> -> vector<16x1xf32>
    %44 = vector.broadcast %43 : vector<16x1xf32> to vector<16x16xf32>
    %45 = arith.mulf %40, %44 : vector<16x16xf32>
    %46 = arith.truncf %45 : vector<16x16xf32> to vector<16x16xbf16>
    %47 = arith.truncf %29 : vector<16x8xf32> to vector<16x8xbf16>
    %cst_28 = arith.constant dense<0.000000e+00> : vector<16x8xf32>
    %48 = tpu.matmul %46, %47, %cst_28 {dimension_numbers = #tpu.dot_dimension_numbers<[1], [0], [0], [1], [0, 0, 1, 1], [], []>} : vector<16x16xbf16>, vector<16x8xbf16>, vector<16x8xf32> -> vector<16x8xf32>
    %49 = vector.extract_strided_slice %26 {offsets = [0, 8], sizes = [16, 8], strides = [1, 1]} : vector<16x96xf32> to vector<16x8xf32>
    %50 = vector.extract_strided_slice %26 {offsets = [0, 40], sizes = [16, 8], strides = [1, 1]} : vector<16x96xf32> to vector<16x8xf32>
    %51 = vector.extract_strided_slice %26 {offsets = [0, 72], sizes = [16, 8], strides = [1, 1]} : vector<16x96xf32> to vector<16x8xf32>
    %52 = arith.truncf %49 : vector<16x8xf32> to vector<16x8xbf16>
    %53 = arith.truncf %50 : vector<16x8xf32> to vector<16x8xbf16>
    %cst_29 = arith.constant dense<0.000000e+00> : vector<16x16xf32>
    %54 = tpu.matmul %52, %53, %cst_29 {dimension_numbers = #tpu.dot_dimension_numbers<[1], [1], [0], [0], [0, 0, 1, 0], [], []>} : vector<16x8xbf16>, vector<16x8xbf16>, vector<16x16xf32> -> vector<16x16xf32>
    %cst_30 = arith.constant 0.353553385 : f32
    %55 = vector.broadcast %cst_30 : f32 to vector<16x16xf32>
    %56 = arith.mulf %54, %55 : vector<16x16xf32>
    %57 = arith.addf %56, %4 : vector<16x16xf32>
    %cst_31 = arith.constant dense<0xFF800000> : vector<16xf32>
    %58 = vector.multi_reduction <maximumf>, %57, %cst_31 [1] : vector<16x16xf32> to vector<16xf32>
    %59 = vector.shape_cast %58 : vector<16xf32> to vector<16x1xf32>
    %60 = vector.broadcast %59 : vector<16x1xf32> to vector<16x16xf32>
    %61 = arith.subf %57, %60 : vector<16x16xf32>
    %62 = math.exp %61 : vector<16x16xf32>
    %cst_32 = arith.constant dense<0.000000e+00> : vector<16xf32>
    %63 = vector.multi_reduction <add>, %62, %cst_32 [1] : vector<16x16xf32> to vector<16xf32>
    %64 = vector.shape_cast %63 : vector<16xf32> to vector<16x1xf32>
    %65 = tpu.reciprocal %64 {approx = true} : vector<16x1xf32> -> vector<16x1xf32>
    %66 = vector.broadcast %65 : vector<16x1xf32> to vector<16x16xf32>
    %67 = arith.mulf %62, %66 : vector<16x16xf32>
    %68 = arith.truncf %67 : vector<16x16xf32> to vector<16x16xbf16>
    %69 = arith.truncf %51 : vector<16x8xf32> to vector<16x8xbf16>
    %cst_33 = arith.constant dense<0.000000e+00> : vector<16x8xf32>
    %70 = tpu.matmul %68, %69, %cst_33 {dimension_numbers = #tpu.dot_dimension_numbers<[1], [0], [0], [1], [0, 0, 1, 1], [], []>} : vector<16x16xbf16>, vector<16x8xbf16>, vector<16x8xf32> -> vector<16x8xf32>
    %71 = vector.extract_strided_slice %26 {offsets = [0, 16], sizes = [16, 8], strides = [1, 1]} : vector<16x96xf32> to vector<16x8xf32>
    %72 = vector.extract_strided_slice %26 {offsets = [0, 48], sizes = [16, 8], strides = [1, 1]} : vector<16x96xf32> to vector<16x8xf32>
    %73 = vector.extract_strided_slice %26 {offsets = [0, 80], sizes = [16, 8], strides = [1, 1]} : vector<16x96xf32> to vector<16x8xf32>
    %74 = arith.truncf %71 : vector<16x8xf32> to vector<16x8xbf16>
    %75 = arith.truncf %72 : vector<16x8xf32> to vector<16x8xbf16>
    %cst_34 = arith.constant dense<0.000000e+00> : vector<16x16xf32>
    %76 = tpu.matmul %74, %75, %cst_34 {dimension_numbers = #tpu.dot_dimension_numbers<[1], [1], [0], [0], [0, 0, 1, 0], [], []>} : vector<16x8xbf16>, vector<16x8xbf16>, vector<16x16xf32> -> vector<16x16xf32>
    %cst_35 = arith.constant 0.353553385 : f32
    %77 = vector.broadcast %cst_35 : f32 to vector<16x16xf32>
    %78 = arith.mulf %76, %77 : vector<16x16xf32>
    %79 = arith.addf %78, %4 : vector<16x16xf32>
    %cst_36 = arith.constant dense<0xFF800000> : vector<16xf32>
    %80 = vector.multi_reduction <maximumf>, %79, %cst_36 [1] : vector<16x16xf32> to vector<16xf32>
    %81 = vector.shape_cast %80 : vector<16xf32> to vector<16x1xf32>
    %82 = vector.broadcast %81 : vector<16x1xf32> to vector<16x16xf32>
    %83 = arith.subf %79, %82 : vector<16x16xf32>
    %84 = math.exp %83 : vector<16x16xf32>
    %cst_37 = arith.constant dense<0.000000e+00> : vector<16xf32>
    %85 = vector.multi_reduction <add>, %84, %cst_37 [1] : vector<16x16xf32> to vector<16xf32>
    %86 = vector.shape_cast %85 : vector<16xf32> to vector<16x1xf32>
    %87 = tpu.reciprocal %86 {approx = true} : vector<16x1xf32> -> vector<16x1xf32>
    %88 = vector.broadcast %87 : vector<16x1xf32> to vector<16x16xf32>
    %89 = arith.mulf %84, %88 : vector<16x16xf32>
    %90 = arith.truncf %89 : vector<16x16xf32> to vector<16x16xbf16>
    %91 = arith.truncf %73 : vector<16x8xf32> to vector<16x8xbf16>
    %cst_38 = arith.constant dense<0.000000e+00> : vector<16x8xf32>
    %92 = tpu.matmul %90, %91, %cst_38 {dimension_numbers = #tpu.dot_dimension_numbers<[1], [0], [0], [1], [0, 0, 1, 1], [], []>} : vector<16x16xbf16>, vector<16x8xbf16>, vector<16x8xf32> -> vector<16x8xf32>
    %93 = vector.extract_strided_slice %26 {offsets = [0, 24], sizes = [16, 8], strides = [1, 1]} : vector<16x96xf32> to vector<16x8xf32>
    %94 = vector.extract_strided_slice %26 {offsets = [0, 56], sizes = [16, 8], strides = [1, 1]} : vector<16x96xf32> to vector<16x8xf32>
    %95 = vector.extract_strided_slice %26 {offsets = [0, 88], sizes = [16, 8], strides = [1, 1]} : vector<16x96xf32> to vector<16x8xf32>
    %96 = arith.truncf %93 : vector<16x8xf32> to vector<16x8xbf16>
    %97 = arith.truncf %94 : vector<16x8xf32> to vector<16x8xbf16>
    %cst_39 = arith.constant dense<0.000000e+00> : vector<16x16xf32>
    %98 = tpu.matmul %96, %97, %cst_39 {dimension_numbers = #tpu.dot_dimension_numbers<[1], [1], [0], [0], [0, 0, 1, 0], [], []>} : vector<16x8xbf16>, vector<16x8xbf16>, vector<16x16xf32> -> vector<16x16xf32>
    %cst_40 = arith.constant 0.353553385 : f32
    %99 = vector.broadcast %cst_40 : f32 to vector<16x16xf32>
    %100 = arith.mulf %98, %99 : vector<16x16xf32>
    %101 = arith.addf %100, %4 : vector<16x16xf32>
    %cst_41 = arith.constant dense<0xFF800000> : vector<16xf32>
    %102 = vector.multi_reduction <maximumf>, %101, %cst_41 [1] : vector<16x16xf32> to vector<16xf32>
    %103 = vector.shape_cast %102 : vector<16xf32> to vector<16x1xf32>
    %104 = vector.broadcast %103 : vector<16x1xf32> to vector<16x16xf32>
    %105 = arith.subf %101, %104 : vector<16x16xf32>
    %106 = math.exp %105 : vector<16x16xf32>
    %cst_42 = arith.constant dense<0.000000e+00> : vector<16xf32>
    %107 = vector.multi_reduction <add>, %106, %cst_42 [1] : vector<16x16xf32> to vector<16xf32>
    %108 = vector.shape_cast %107 : vector<16xf32> to vector<16x1xf32>
    %109 = tpu.reciprocal %108 {approx = true} : vector<16x1xf32> -> vector<16x1xf32>
    %110 = vector.broadcast %109 : vector<16x1xf32> to vector<16x16xf32>
    %111 = arith.mulf %106, %110 : vector<16x16xf32>
    %112 = arith.truncf %111 : vector<16x16xf32> to vector<16x16xbf16>
    %113 = arith.truncf %95 : vector<16x8xf32> to vector<16x8xbf16>
    %cst_43 = arith.constant dense<0.000000e+00> : vector<16x8xf32>
    %114 = tpu.matmul %112, %113, %cst_43 {dimension_numbers = #tpu.dot_dimension_numbers<[1], [0], [0], [1], [0, 0, 1, 1], [], []>} : vector<16x16xbf16>, vector<16x8xbf16>, vector<16x8xf32> -> vector<16x8xf32>
    %115 = tpu.concatenate %48, %70, %92, %114 in 1 : vector<16x8xf32>, vector<16x8xf32>, vector<16x8xf32>, vector<16x8xf32> -> vector<16x32xf32>
    %116 = arith.truncf %115 : vector<16x32xf32> to vector<16x32xbf16>
    %c0_44 = arith.constant 0 : index
    %c0_45 = arith.constant 0 : index
    %c0_46 = arith.constant 0 : index
    %117 = vector.load %arg6[%c0_44, %c0_45, %c0_46] : memref<1x32x32xbf16, #tpu.memory_space<vmem>>, vector<1x32x32xbf16>
    %118 = vector.shape_cast %117 : vector<1x32x32xbf16> to vector<32x32xbf16>
    %cst_47 = arith.constant dense<0.000000e+00> : vector<16x32xf32>
    %119 = tpu.matmul %116, %118, %cst_47 {dimension_numbers = #tpu.dot_dimension_numbers<[1], [0], [0], [1], [0, 0, 1, 1], [], []>} : vector<16x32xbf16>, vector<32x32xbf16>, vector<16x32xf32> -> vector<16x32xf32>
    %120 = vector.broadcast %8 : vector<1x32xf32> to vector<16x32xf32>
    %121 = arith.addf %119, %120 : vector<16x32xf32>
    %122 = arith.addf %3, %121 : vector<16x32xf32>
    %cst_48 = arith.constant dense<0.000000e+00> : vector<16xf32>
    %123 = vector.multi_reduction <add>, %122, %cst_48 [1] : vector<16x32xf32> to vector<16xf32>
    %124 = vector.shape_cast %123 : vector<16xf32> to vector<16x1xf32>
    %cst_49 = arith.constant 3.200000e+01 : f32
    %125 = vector.broadcast %cst_49 : f32 to vector<16x1xf32>
    %126 = arith.divf %124, %125 : vector<16x1xf32>
    %127 = vector.broadcast %126 : vector<16x1xf32> to vector<16x32xf32>
    %128 = arith.subf %122, %127 : vector<16x32xf32>
    %129 = arith.mulf %128, %128 : vector<16x32xf32>
    %cst_50 = arith.constant dense<0.000000e+00> : vector<16xf32>
    %130 = vector.multi_reduction <add>, %129, %cst_50 [1] : vector<16x32xf32> to vector<16xf32>
    %131 = vector.shape_cast %130 : vector<16xf32> to vector<16x1xf32>
    %cst_51 = arith.constant 3.200000e+01 : f32
    %132 = vector.broadcast %cst_51 : f32 to vector<16x1xf32>
    %133 = arith.divf %131, %132 : vector<16x1xf32>
    %134 = vector.broadcast %126 : vector<16x1xf32> to vector<16x32xf32>
    %135 = arith.subf %122, %134 : vector<16x32xf32>
    %cst_52 = arith.constant 9.99999974E-6 : f32
    %136 = vector.broadcast %cst_52 : f32 to vector<16x1xf32>
    %137 = arith.addf %133, %136 : vector<16x1xf32>
    %138 = math.rsqrt %137 : vector<16x1xf32>
    %139 = vector.broadcast %138 : vector<16x1xf32> to vector<16x32xf32>
    %140 = arith.mulf %135, %139 : vector<16x32xf32>
    %141 = vector.broadcast %10 : vector<1x32xf32> to vector<16x32xf32>
    %142 = arith.mulf %140, %141 : vector<16x32xf32>
    %143 = vector.broadcast %12 : vector<1x32xf32> to vector<16x32xf32>
    %144 = arith.addf %142, %143 : vector<16x32xf32>
    %145 = arith.truncf %144 : vector<16x32xf32> to vector<16x32xbf16>
    %c0_53 = arith.constant 0 : index
    %c0_54 = arith.constant 0 : index
    %c0_55 = arith.constant 0 : index
    %146 = vector.load %arg7[%c0_53, %c0_54, %c0_55] : memref<1x32x64xbf16, #tpu.memory_space<vmem>>, vector<1x32x64xbf16>
    %147 = vector.shape_cast %146 : vector<1x32x64xbf16> to vector<32x64xbf16>
    %cst_56 = arith.constant dense<0.000000e+00> : vector<16x64xf32>
    %148 = tpu.matmul %145, %147, %cst_56 {dimension_numbers = #tpu.dot_dimension_numbers<[1], [0], [0], [1], [0, 0, 1, 1], [], []>} : vector<16x32xbf16>, vector<32x64xbf16>, vector<16x64xf32> -> vector<16x64xf32>
    %149 = vector.broadcast %14 : vector<1x64xf32> to vector<16x64xf32>
    %150 = arith.addf %148, %149 : vector<16x64xf32>
    %cst_57 = arith.constant 0.000000e+00 : f32
    %151 = vector.broadcast %cst_57 : f32 to vector<16x64xf32>
    %152 = arith.maximumf %150, %151 : vector<16x64xf32>
    %153 = arith.truncf %152 : vector<16x64xf32> to vector<16x64xbf16>
    %c0_58 = arith.constant 0 : index
    %c0_59 = arith.constant 0 : index
    %c0_60 = arith.constant 0 : index
    %154 = vector.load %arg8[%c0_58, %c0_59, %c0_60] : memref<1x64x32xbf16, #tpu.memory_space<vmem>>, vector<1x64x32xbf16>
    %155 = vector.shape_cast %154 : vector<1x64x32xbf16> to vector<64x32xbf16>
    %cst_61 = arith.constant dense<0.000000e+00> : vector<16x32xf32>
    %156 = tpu.matmul %153, %155, %cst_61 {dimension_numbers = #tpu.dot_dimension_numbers<[1], [0], [0], [1], [0, 0, 1, 1], [], []>} : vector<16x64xbf16>, vector<64x32xbf16>, vector<16x32xf32> -> vector<16x32xf32>
    %157 = vector.broadcast %16 : vector<1x32xf32> to vector<16x32xf32>
    %158 = arith.addf %156, %157 : vector<16x32xf32>
    %159 = arith.addf %144, %158 : vector<16x32xf32>
    %cst_62 = arith.constant dense<0.000000e+00> : vector<16xf32>
    %160 = vector.multi_reduction <add>, %159, %cst_62 [1] : vector<16x32xf32> to vector<16xf32>
    %161 = vector.shape_cast %160 : vector<16xf32> to vector<16x1xf32>
    %cst_63 = arith.constant 3.200000e+01 : f32
    %162 = vector.broadcast %cst_63 : f32 to vector<16x1xf32>
    %163 = arith.divf %161, %162 : vector<16x1xf32>
    %164 = vector.broadcast %163 : vector<16x1xf32> to vector<16x32xf32>
    %165 = arith.subf %159, %164 : vector<16x32xf32>
    %166 = arith.mulf %165, %165 : vector<16x32xf32>
    %cst_64 = arith.constant dense<0.000000e+00> : vector<16xf32>
    %167 = vector.multi_reduction <add>, %166, %cst_64 [1] : vector<16x32xf32> to vector<16xf32>
    %168 = vector.shape_cast %167 : vector<16xf32> to vector<16x1xf32>
    %cst_65 = arith.constant 3.200000e+01 : f32
    %169 = vector.broadcast %cst_65 : f32 to vector<16x1xf32>
    %170 = arith.divf %168, %169 : vector<16x1xf32>
    %171 = vector.broadcast %163 : vector<16x1xf32> to vector<16x32xf32>
    %172 = arith.subf %159, %171 : vector<16x32xf32>
    %cst_66 = arith.constant 9.99999974E-6 : f32
    %173 = vector.broadcast %cst_66 : f32 to vector<16x1xf32>
    %174 = arith.addf %170, %173 : vector<16x1xf32>
    %175 = math.rsqrt %174 : vector<16x1xf32>
    %176 = vector.broadcast %175 : vector<16x1xf32> to vector<16x32xf32>
    %177 = arith.mulf %172, %176 : vector<16x32xf32>
    %178 = vector.broadcast %18 : vector<1x32xf32> to vector<16x32xf32>
    %179 = arith.mulf %177, %178 : vector<16x32xf32>
    %180 = vector.broadcast %20 : vector<1x32xf32> to vector<16x32xf32>
    %181 = arith.addf %179, %180 : vector<16x32xf32>
    %c0_67 = arith.constant 0 : index
    %c0_68 = arith.constant 0 : index
    %182 = vector.load %arg13[%c0_67, %c0_68] : memref<16x32xf32, #tpu.memory_space<vmem>>, vector<16x32xf32>
    tpu.vector_store %arg13[%c0_67, %c0_68], %181 {strides = array<i32>} : memref<16x32xf32, #tpu.memory_space<vmem>>, vector<16x32xf32>,
    %c1_i32 = arith.constant 1 : i32
    %183 = arith.cmpi eq, %arg1, %c1_i32 : i32
    %184 = arith.extui %183 : i1 to i32
    %c0_i32_69 = arith.constant 0 : i32
    %185 = arith.cmpi ne, %184, %c0_i32_69 : i32
    scf.if %185 {
      %186 = arith.truncf %181 : vector<16x32xf32> to vector<16x32xbf16>
      %c0_70 = arith.constant 0 : index
      %c0_71 = arith.constant 0 : index
      %187 = vector.load %arg10[%c0_70, %c0_71] : memref<32x16xbf16, #tpu.memory_space<vmem>>, vector<32x16xbf16>
      %cst_72 = arith.constant dense<0.000000e+00> : vector<16x16xf32>
      %188 = tpu.matmul %186, %187, %cst_72 {dimension_numbers = #tpu.dot_dimension_numbers<[1], [0], [0], [1], [0, 0, 1, 1], [], []>} : vector<16x32xbf16>, vector<32x16xbf16>, vector<16x16xf32> -> vector<16x16xf32>
      %c0_73 = arith.constant 0 : index
      %c0_74 = arith.constant 0 : index
      %189 = vector.load %arg11[%c0_73, %c0_74] : memref<1x16xf32, #tpu.memory_space<vmem>>, vector<1x16xf32>
      %190 = vector.broadcast %189 : vector<1x16xf32> to vector<16x16xf32>
      %191 = arith.addf %188, %190 : vector<16x16xf32>
      %c0_75 = arith.constant 0 : index
      %c0_76 = arith.constant 0 : index
      %192 = vector.load %arg12[%c0_75, %c0_76] : memref<16x16xf32, #tpu.memory_space<vmem>>, vector<16x16xf32>
      tpu.vector_store %arg12[%c0_75, %c0_76], %191 {strides = array<i32>} : memref<16x16xf32, #tpu.memory_space<vmem>>, vector<16x16xf32>,
    } else {
    }
    return
  }
  func.func @transform_0(%arg0: i32, %arg1: i32) -> (i32, i32) {
    %c0_i32 = arith.constant 0 : i32
    %c0_i32_0 = arith.constant 0 : i32
    return %arg0, %c0_i32 : i32, i32
  }
  func.func @transform_1(%arg0: i32, %arg1: i32) -> (i32, i32) {
    %c0_i32 = arith.constant 0 : i32
    %c0_i32_0 = arith.constant 0 : i32
    %c0_i32_1 = arith.constant 0 : i32
    return %c0_i32, %c0_i32_0 : i32, i32
  }
  func.func @transform_2(%arg0: i32, %arg1: i32) -> (i32, i32) {
    %c0_i32 = arith.constant 0 : i32
    %c0_i32_0 = arith.constant 0 : i32
    %c0_i32_1 = arith.constant 0 : i32
    return %c0_i32, %c0_i32_0 : i32, i32
  }
  func.func @transform_3(%arg0: i32, %arg1: i32) -> (i32, i32, i32) {
    %c0_i32 = arith.constant 0 : i32
    %c0_i32_0 = arith.constant 0 : i32
    %c0_i32_1 = arith.constant 0 : i32
    return %arg1, %c0_i32, %c0_i32_0 : i32, i32, i32
  }
  func.func @transform_4(%arg0: i32, %arg1: i32) -> (i32, i32, i32) {
    %c0_i32 = arith.constant 0 : i32
    %c0_i32_0 = arith.constant 0 : i32
    %c0_i32_1 = arith.constant 0 : i32
    return %arg1, %c0_i32, %c0_i32_0 : i32, i32, i32
  }
  func.func @transform_5(%arg0: i32, %arg1: i32) -> (i32, i32, i32) {
    %c0_i32 = arith.constant 0 : i32
    %c0_i32_0 = arith.constant 0 : i32
    %c0_i32_1 = arith.constant 0 : i32
    return %arg1, %c0_i32, %c0_i32_0 : i32, i32, i32
  }
  func.func @transform_6(%arg0: i32, %arg1: i32) -> (i32, i32, i32) {
    %c0_i32 = arith.constant 0 : i32
    %c0_i32_0 = arith.constant 0 : i32
    %c0_i32_1 = arith.constant 0 : i32
    return %arg1, %c0_i32, %c0_i32_0 : i32, i32, i32
  }
  func.func @transform_7(%arg0: i32, %arg1: i32) -> (i32, i32, i32) {
    %c0_i32 = arith.constant 0 : i32
    %c0_i32_0 = arith.constant 0 : i32
    %c0_i32_1 = arith.constant 0 : i32
    return %arg1, %c0_i32, %c0_i32_0 : i32, i32, i32
  }
  func.func @transform_8(%arg0: i32, %arg1: i32) -> (i32, i32) {
    %c0_i32 = arith.constant 0 : i32
    %c0_i32_0 = arith.constant 0 : i32
    %c0_i32_1 = arith.constant 0 : i32
    return %c0_i32, %c0_i32_0 : i32, i32
  }
  func.func @transform_9(%arg0: i32, %arg1: i32) -> (i32, i32) {
    %c0_i32 = arith.constant 0 : i32
    %c0_i32_0 = arith.constant 0 : i32
    %c0_i32_1 = arith.constant 0 : i32
    return %c0_i32, %c0_i32_0 : i32, i32
  }
  func.func @transform_10(%arg0: i32, %arg1: i32) -> (i32, i32) {
    %c0_i32 = arith.constant 0 : i32
    %c0_i32_0 = arith.constant 0 : i32
    return %arg0, %c0_i32 : i32, i32
  }
}

</mosaic_0001>

<bundles_post_ra>
// kernel: tpu_custom_call.1
= control target key start
LH: loop header
LB: loop body
LE: loop exit
PB: predicated region body
PF: predicated region fallthrough
CT: control target
= control target key end

     0   :  { %s2539_s0 = inlined_call_operand.hbm [shape: f32[16,32], index: 0, kind: input, shape index: {}]   ;;  %s2540_s1 = inlined_call_operand.hbm [shape: f32[16,32], index: 1, kind: input, shape index: {}]   ;;  %s2541_s2 = inlined_call_operand.hbm [shape: f32[16,16], index: 2, kind: input, shape index: {}]   ;;  %s2542_s3 = inlined_call_operand.vmem [shape: bf16[2,32,96], index: 3, kind: input, shape index: {}]   ;;  %s2543_s4 = inlined_call_operand.vmem [shape: bf16[2,32,32], index: 4, kind: input, shape index: {}]   ;;  %s2544_s5 = inlined_call_operand.vmem [shape: bf16[2,32,64], index: 5, kind: input, shape index: {}]   ;;  %s2545_s6 = inlined_call_operand.vmem [shape: bf16[2,64,32], index: 6, kind: input, shape index: {}]   ;;  %s2546_s7 = inlined_call_operand.vmem [shape: f32[2,8,96], index: 7, kind: input, shape index: {}]   ;;  %s2547_s8 = inlined_call_operand.vmem [shape: bf16[32,16], index: 8, kind: input, shape index: {}]   ;;  %s2548_s9 = inlined_call_operand.vmem [shape: f32[1,16], index: 9, kind: input, shape index: {}]   ;;  %s2549_s10 = inlined_call_operand.hbm [shape: f32[16,16], index: 10, kind: output, shape index: {}]  }
   0x1   :  { %2556 = sst [smem:[#allocation14_spill]] %s2549_s10 }
   0x2   :  { %15 = vsyncpa [#allocation4], 0 }
   0x3   :  { %16 = vsyncpa [#allocation7], 0 }
   0x4   :  { %17 = vsyncpa [#allocation5], 0  ;;  %s2197_s13 = smov 0   ;;  %s2199_s14 = smov 0  }
   0x5   :  { %s2201_s15 = smov 0  }
   0x6 LB: > { %2557 = sst [smem:[#allocation13_spill]] %s2111_s14  ;;  %s2552_s16 = sadd.s32 4294967295, %s2115_s15   ;;  %s2115_s15 = sphi %s2201_s15, %s23_s15   ;;  %s2111_s14 = sphi %s2199_s14, %s2569_s14   ;;  %s2107_s13 = sphi %s2197_s13, %s2568_s13  }
   0x7   : > { %p1634_p0 = scmp.ge.s32.totalorder %s2115_s15, 1  ;;  %p306_p1 = scmp.lt.s32.totalorder %s2115_s15, 3 }
   0x8   : > { %p2217_p2 = scmp.eq.s32.totalorder %s2552_s16, 0  ;;  %s2117_s19 = smov [#allocation6]  }
   0x9   : > { %p2221_p3 = pnand %p1634_p0, %p306_p1  ;;  %s334_s20 = sshll.u32 %s2117_s19, 4  ;;  %s2225_s20 = int_to_ptr.vmem [resolvable:$true] %s334_s20 }
   0xa   : > { %s2558_s17 = scalar_select %p2217_p2, 1, 0 }
   0xb   : > { %s2559_s18 = scalar_select %p2221_p3, 1, 0 }
   0xc   : > { %p1837_p4 = pneg %p2221_p3  ;;  %s32_s22 = sadd.s32 1, %s2111_s14 }
   0xd   : > { %p2236_p6 = scmp.ge.s32.totalorder %s32_s22, 2  ;;  %s2118_s24 = smov [#allocation3]  }
   0xe   : > { %p2231_p5 = pnand %p2217_p2, %p1837_p4  ;;  %s321_s25 = sshll.u32 %s2118_s24, 4  ;;  %s322_s25 = int_to_ptr.vmem [resolvable:$true] %s321_s25 }
   0xf   : > { %s1971_s28 = scalar_lea.hbm %s2540_s1, 256 }
  0x10   : > { %p1972_p7 = scmp.ne.s32.totalorder %s2540_s1, %s1971_s28  ;;  %p2248_p8 = pneg %p2231_p5 }
  0x11   : > { %p1978_p11 = scmp.lt.u32.totalorder %s1971_s28, %s2540_s1 }
  0x12   : > { %p1974_p9 = pnand %p2248_p8, %p1972_p7 }
  0x14   : > { %p1975_p10 = pneg %p1974_p9 }
  0x16   : > { %p1980_p12 = pnand %p1978_p11, %p1975_p10 }
  0x18   : > { %1983 = shalt.err (!%p1980_p12)
}
  0x19   : > { %s1984_s24 = scalar_lea.vmem %s2225_s20, 256  ;;  %p1992_p4 = scmp.lt.s32.totalorder %s2225_s20, %s2225_s20 }
  0x1a   : > { %p1985_p13 = scmp.ne.s32.totalorder %s2225_s20, %s1984_s24  ;;  %p1993_p2 = scmp.lt.s32.totalorder %s1984_s24, %s1984_s24 }
  0x1c   : > { %p1987_p0 = pnand %p1985_p13, %p2248_p8  ;;  %p1994_p7 = por %p1993_p2, %p1992_p4 }
  0x1e   : > { %p1988_p1 = pneg %p1987_p0 }
  0x20   : > { %p1995_p9 = pnand %p1994_p7, %p1988_p1 }
  0x22   : > { %1998 = shalt.err (!%p1995_p9)
}
  0x23   : > { %s2119_s26 = smov 128   ;;  %s2120_s27 = smov 8  }
  0x24   : > { %1843 = dma.hbm_to_vmem [thread:$0]  (!%p2231_p5), %s2540_s1, 256, %s2225_s20, [#allocation7], %s2119_s26, %s2119_s26, %s2120_s27  }
  0x25   : > { %s2571_s22 = smov (%p2236_p6, %s32_s22), 0  ;;  %s1999_s19 = scalar_lea.hbm %s2539_s0, 256 }
  0x26   : > { %p2000_p2 = scmp.ne.s32.totalorder %s2539_s0, %s1999_s19  ;;  %p2006_p12 = scmp.lt.u32.totalorder %s1999_s19, %s2539_s0 }
  0x28   : > { %p2002_p10 = pnand %p2000_p2, %p2248_p8 }
  0x2a   : > { %p2003_p11 = pneg %p2002_p10 }
  0x2c   : > { %p2008_p13 = pnand %p2006_p12, %p2003_p11 }
  0x2e   : > { %2011 = shalt.err (!%p2008_p13)
}
  0x2f   : > { %s2012_s20 = scalar_lea.vmem %s322_s25, 256  ;;  %p2020_p4 = scmp.lt.s32.totalorder %s322_s25, %s322_s25 }
  0x30   : > { %p2013_p6 = scmp.ne.s32.totalorder %s322_s25, %s2012_s20  ;;  %p2021_p7 = scmp.lt.s32.totalorder %s2012_s20, %s2012_s20 }
  0x32   : > { %p2015_p0 = pnand %p2013_p6, %p2248_p8  ;;  %p2022_p9 = por %p2021_p7, %p2020_p4 }
  0x34   : > { %p2016_p1 = pneg %p2015_p0 }
  0x36   : > { %p2023_p3 = pnand %p2022_p9, %p2016_p1 }
  0x38   : > { %2026 = shalt.err (!%p2023_p3)
}
  0x39   : > { %1840 = dma.hbm_to_vmem [thread:$0]  (!%p2231_p5), %s2539_s0, 256, %s322_s25, [#allocation4], %s2119_s26, %s2119_s26, %s2120_s27  }
  0x3a   : > { %s2121_s16 = smov [#allocation8]   ;;  %s2027_s30 = scalar_lea.hbm %s2541_s2, 256 }
  0x3b   : > { %s347_s23 = sshll.u32 %s2121_s16, 4  ;;  %p2028_p3 = scmp.ne.s32.totalorder %s2541_s2, %s2027_s30  ;;  %s348_s23 = int_to_ptr.vmem [resolvable:$true] %s347_s23 }
  0x3c   : > { %p2034_p11 = scmp.lt.u32.totalorder %s2027_s30, %s2541_s2 }
  0x3d   : > { %p2030_p2 = pnand %p2028_p3, %p2248_p8 }
  0x3f   : > { %p2031_p10 = pneg %p2030_p2 }
  0x41   : > { %p2036_p12 = pnand %p2034_p11, %p2031_p10 }
  0x43   : > { %2039 = shalt.err (!%p2036_p12)
}
  0x44   : > { %s2040_s25 = scalar_lea.vmem %s348_s23, 256  ;;  %p2048_p1 = scmp.lt.s32.totalorder %s348_s23, %s348_s23 }
  0x45   : > { %p2041_p13 = scmp.ne.s32.totalorder %s348_s23, %s2040_s25  ;;  %p2049_p4 = scmp.lt.s32.totalorder %s2040_s25, %s2040_s25 }
  0x47   : > { %p2043_p6 = pnand %p2041_p13, %p2248_p8  ;;  %p2050_p7 = por %p2049_p4, %p2048_p1 }
  0x49   : > { %p2044_p0 = pneg %p2043_p6 }
  0x4b   : > { %p2051_p9 = pnand %p2050_p7, %p2044_p0 }
  0x4d   : > { %2054 = shalt.err (!%p2051_p9)
}
  0x4e   : > { %1846 = dma.hbm_to_vmem [thread:$0]  (!%p2231_p5), %s2541_s2, 256, %s348_s23, [#allocation7], %s2119_s26, %s2119_s26, %s2120_s27  }
  0x4f   : > { %p2563_p3 = scmp.ne.s32.totalorder %s2559_s18, 0 }
  0x50   : > { %p2564_p8 = scmp.ne.s32.totalorder (!%p2563_p3), %s2558_s17, 0 }
  0x51   : > { %408 = sbr.rel (%p2563_p3) target bundleno = 2927 (0xb6f), region = 60 }
  0x58   : > { %2094 = dma.done.wait (%p2564_p8), [#allocation4], 256  }
  0x59   : > { %2096 = vsyncadd (%p2564_p8), [#allocation4], 4294967040 }
  0x5a   : > { %2098 = dma.done.wait (%p2564_p8), [#allocation7], 512  }
  0x5b   : > { %2100 = vsyncadd (%p2564_p8), [#allocation7], 4294966784  ;;  %p469_p2 = scmp.lt.s32.totalorder %s2107_s13, 1  ;;  %p1652_p5 = scmp.ne.s32.totalorder %s2107_s13, 0 }
  0x5c   : > { %v499_v0 = vld [vmem:[#allocation3] sm:$0xff] (!%p1652_p5)  ;;  %v501_v1 = vld [vmem:[#allocation6] sm:$0xff] (!%p1652_p5)  ;;  %vm505_vm0 = vcmask (!%p1652_p5), 261120   ;;  %v500_v2 = vld [vmem:[#allocation3 + $0x8] sm:$0xff] (!%p1652_p5) }
  0x5d   : > { %s470_s21 = scalar_select %p469_p2, %s2107_s13, 1 }
  0x5e   : > { %498 = sbr.rel (%p1652_p5) target bundleno = 101 (0x65), region = 76  ;;  %v503_v3 = vadd.f32 (!%p1652_p5), %v501_v1, %v499_v0  ;;  %v502_v4 = vld [vmem:[#allocation6 + $0x8] sm:$0xff] (!%p1652_p5) }
  0x5f   : > { %s1692_s11 = sshll.u32 %s470_s21, 4  ;;  %s1695_s26 = sshll.u32 %s470_s21, 5  ;;  %v504_v5 = vadd.f32 (!%p1652_p5), %v502_v4, %v500_v2 }
  0x60   : > { %s473_s16 = scalar_lea.vmem %s2542_s3, %s1692_s11  ;;  %s2336_s29 = scalar_lea.vmem %s2543_s4, %s1692_s11  ;;  %506 = vst.msk [vmem:[#allocation2] sm:$0xff] (!%p1652_p5), %vm505_vm0, %v503_v3 }
  0x61   : > { %s2341_s17 = scalar_lea.vmem %s2544_s5, %s1692_s11  ;;  %s2346_s20 = scalar_lea.vmem %s2545_s6, %s1695_s26  ;;  %507 = vst.msk [vmem:[#allocation2 + $0x8] sm:$0xff] (!%p1652_p5), %vm505_vm0, %v504_v5 }
  0x62   : > { %s1651_s25 = sshll.u32 %s470_s21, 3 }
  0x63   : > { %s2351_s18 = scalar_lea.vmem %s2546_s7, %s1651_s25 }
  0x65 PF: > { %v1919_v6 = vld [vmem:[%s473_s16] sm:$0xff]   ;;  %v2122_v7 = vmov 0.0   ;;  %v1920_v8 = vld [vmem:[%s473_s16 + $0x8] sm:$0xff]   ;;  %vm2123_vm1 = vmmov 0   ;;  %vm541_vm2 = vcmask 261120   ;;  %s2124_s21 = smov 120  }
  0x66   : > { %1729 = vmatprep.subr.bf16.mxu0 %v2122_v7  ;;  %1737 = vmatprep.subr.bf16.mxu1 %v2122_v7  ;;  %v1653_v12 = vld [vmem:[%s2351_s18] ss:$0 sm:$0xff]  ;;  %s2125_s11 = smov 96   ;;  %s2126_s26 = smov 80   ;;  %vm590_vm3 = vcmask 64512   ;;  %v510_v32 = vld [vmem:[#allocation8] sm:$0xff] }
  0x67   : > { %1730 = vmatpush3.bf16.msra.mxu0 %v1919_v6  ;;  %1733 = vmatprep.mubr.msk.bf16.mxu0 %vm2123_vm1, %v2122_v7  ;;  %v2358_v9 = vld [vmem:[#allocation2] sm:$0xff]  ;;  %s2127_s27 = smov 88   ;;  %s2128_s16 = smov 72   ;;  %vm642_vm4 = vcmask 130048   ;;  %v511_v36 = vld [vmem:[#allocation8 + $0x8] sm:$0xff]  ;;  %vm1116_vm5 = vcmask 195584  }
  0x68   : > { %v2360_v10 = vld [vmem:[#allocation2 + $0x8] sm:$0xff]  ;;  %1731 = vmatprep.subr.bf16.mxu0 %v2122_v7  ;;  %1739 = vmatprep.mubr.msk.bf16.mxu1 %vm2123_vm1, %v2122_v7  ;;  %s2129_s23 = smov 112   ;;  %s2130_s28 = smov 104   ;;  %vm1329_vm6 = vcmask 523264  }
  0x69   : > { %v520_v11 = vpack.c.bf16 %v2360_v10, %v2358_v9  ;;  %s2131_s30 = smov 56   ;;  %s2132_s12 = smov 64  }
  0x6a   : > { %s2133_s19 = smov 48   ;;  %s2134_s24 = smov 40  }
  0x6b   : > { %1732 = vmatpush3.bf16.msra.mxu0 %v1920_v8  ;;  %s2135_s25 = smov 8   ;;  %s2136_s10 = smov 16  }
  0x6c   : > { %1743 = vmatprep.subr.bf16.mxu0 %v2122_v7  ;;  %s2137_s14 = smov 24   ;;  %p1683_p10 = scmp.ne.s32.totalorder %s2107_s13, 1 }
  0x6d   : > { %vm2139_vm7 = vmmov (!%p1683_p10), 0  }
  0x6e   : > { %1734 = vmatmul.mubr.msk.bf16.vlgmr.msra.gmra.mrb[0].mxu0 %vm541_vm2, %v520_v11 }
  0x6f   : > { %1745 = vmatprep.mubr.msk.bf16.mxu0 %vm2123_vm1, %v2122_v7 }
 0x141   : > { %v579_v13 = vpop.f32.mrb[0].mxu0 }
 0x142   : > { %v1735_v14 = vpop.f32.mrb[1].mxu0  ;;  %v580_v16 = vadd.f32 %v1653_v12, %v579_v13 }
 0x143   : > { %v582_v15 = vpop.f32.mrb[2].mxu0 }
 0x144   : > { %v583_v17 = vadd.f32 %v1653_v12, %v582_v15  ;;  %v1736_v18 = vpop.f32.mrb[3].mxu0 }
 0x146   : > { %v2372_v19 = vpack.c.bf16 %v583_v17, %v580_v16 }
 0x148   : > { %713 = vrot.lane.b32.xlu1 %v2372_v19, %s2124_s21  ;;  %588 = vrot.lane.b32.xlu0 %v2372_v19, %s2125_s11 }
 0x14c   : > { %840 = vrot.lane.b32.xlu1 %v2372_v19, %s2126_s26  ;;  %715 = vrot.lane.b32.xlu0 %v2372_v19, %s2127_s27 }
 0x150   : > { %965 = vrot.lane.b32.xlu1 %v2372_v19, %s2128_s16  ;;  %838 = vrot.lane.b32.xlu0 %v2372_v19, %s2129_s23 }
 0x154   : > { %963 = vrot.lane.b32.xlu0 %v2372_v19, %s2130_s28 }
 0x1ba   : > { %v589_v20 = vpop.permute.xlu0 %588  ;;  %v714_v23 = vpop.permute.xlu1 %713 }
 0x1bb   : > { %v595_v21 = vsel %vm590_vm3, %v589_v20, 0 }
 0x1bc   : > { %1738 = vmatpush3.bf16.xpose.msra.mxu1 %v595_v21 }
 0x1bd   : > { %1749 = vmatprep.subr.bf16.mxu1 %v2122_v7 }
 0x1be   : > { %v716_v22 = vpop.permute.xlu0 %715  ;;  %v841_v25 = vpop.permute.xlu1 %840 }
 0x1bf   : > { %v721_v24 = vsel %vm590_vm3, %v716_v22, 0  ;;  %v846_v26 = vsel %vm590_vm3, %v841_v25, 0 }
 0x1c2   : > { %v966_v27 = vpop.permute.xlu1 %965  ;;  %v839_v28 = vpop.permute.xlu0 %838 }
 0x1c3   : > { %1740 = vmatmul.mubr.msk.bf16.vlgmr.msra.gmra.mrb[0].mxu1 %vm590_vm3, %v2372_v19  ;;  %v971_v29 = vsel %vm590_vm3, %v966_v27, 0 }
 0x1c4   : > { %1750 = vmatpush3.bf16.xpose.msra.mxu1 %v721_v24  ;;  %1751 = vmatprep.mubr.msk.bf16.mxu1 %vm2123_vm1, %v2122_v7 }
 0x1c5   : > { %1761 = vmatprep.subr.bf16.mxu1 %v2122_v7 }
 0x1c6   : > { %v964_v30 = vpop.permute.xlu0 %963 }
 0x1cb   : > { %1752 = vmatmul.mubr.msk.bf16.vlgmr.msra.gmra.mrb[4].mxu1 %vm590_vm3, %v714_v23 }
 0x1cc   : > { %1762 = vmatpush3.bf16.xpose.msra.mxu1 %v846_v26  ;;  %1763 = vmatprep.mubr.msk.bf16.mxu1 %vm2123_vm1, %v2122_v7 }
 0x1cd   : > { %1773 = vmatprep.subr.bf16.mxu1 %v2122_v7 }
 0x1d3   : > { %1764 = vmatmul.mubr.msk.bf16.vlgmr.msra.gmra.mrb[8].mxu1 %vm590_vm3, %v839_v28 }
 0x1d4   : > { %1774 = vmatpush3.bf16.xpose.msra.mxu1 %v971_v29  ;;  %1775 = vmatprep.mubr.msk.bf16.mxu1 %vm2123_vm1, %v2122_v7 }
 0x1d5   : > { %1785 = vmatprep.subr.bf16.mxu1 %v2122_v7 }
 0x1db   : > { %1776 = vmatmul.mubr.msk.bf16.vlgmr.msra.gmra.mrb[12].mxu1 %vm590_vm3, %v964_v30 }
 0x1dc   : > { %1789 = vmatprep.mubr.msk.bf16.mxu1 %vm2123_vm1, %v2122_v7 }
 0x296   : > { %v631_v31 = vpop.f32.mrb[0].mxu1 }
 0x297   : > { %v638_v33 = vmul.f32 0.35355338, %v631_v31  ;;  %v1741_v34 = vpop.f32.mrb[1].mxu1 }
 0x298   : > { %v634_v35 = vpop.f32.mrb[2].mxu1 }
 0x299   : > { %v639_v37 = vmul.f32 0.35355338, %v634_v35  ;;  %v1742_v38 = vpop.f32.mrb[3].mxu1  ;;  %v640_v39 = vadd.f32 %v638_v33, %v510_v32 }
 0x29b   : > { %v643_v40 = vsel %vm642_vm4, %v640_v39, -inf  ;;  %v641_v41 = vadd.f32 %v639_v37, %v511_v36 }
 0x29c   : > { %644 = vmax.xlane.f32.xlu1 %v643_v40 }
 0x29d   : > { %v646_v42 = vsel %vm642_vm4, %v641_v41, -inf }
 0x29e   : > { %647 = vmax.xlane.f32.xlu0 %v646_v42  ;;  %v757_v43 = vpop.f32.mrb[4].mxu1 }
 0x29f   : > { %v764_v44 = vmul.f32 0.35355338, %v757_v43  ;;  %v1753_v45 = vpop.f32.mrb[5].mxu1 }
 0x2a0   : > { %v760_v46 = vpop.f32.mrb[6].mxu1 }
 0x2a1   : > { %v765_v47 = vmul.f32 0.35355338, %v760_v46  ;;  %v1754_v48 = vpop.f32.mrb[7].mxu1  ;;  %v766_v49 = vadd.f32 %v764_v44, %v510_v32 }
 0x2a3   : > { %v768_v50 = vsel %vm642_vm4, %v766_v49, -inf  ;;  %v767_v51 = vadd.f32 %v765_v47, %v511_v36 }
 0x2a4   : > { %769 = vmax.xlane.f32.xlu0 %v768_v50 }
 0x2a5   : > { %v771_v52 = vsel %vm642_vm4, %v767_v51, -inf }
 0x2a6   : > { %772 = vmax.xlane.f32.xlu1 %v771_v52  ;;  %v882_v53 = vpop.f32.mrb[8].mxu1 }
 0x2a7   : > { %v889_v54 = vmul.f32 0.35355338, %v882_v53  ;;  %v1765_v55 = vpop.f32.mrb[9].mxu1 }
 0x2a8   : > { %v885_v56 = vpop.f32.mrb[10].mxu1 }
 0x2a9   : > { %v890_v57 = vmul.f32 0.35355338, %v885_v56  ;;  %v1766_v58 = vpop.f32.mrb[11].mxu1  ;;  %v891_v59 = vadd.f32 %v889_v54, %v510_v32 }
 0x2ab   : > { %v893_v60 = vsel %vm642_vm4, %v891_v59, -inf  ;;  %v892_v61 = vadd.f32 %v890_v57, %v511_v36 }
 0x2ac   : > { %894 = vmax.xlane.f32.xlu0 %v893_v60 }
 0x2ad   : > { %v896_v62 = vsel %vm642_vm4, %v892_v61, -inf }
 0x2ae   : > { %897 = vmax.xlane.f32.xlu1 %v896_v62  ;;  %v1007_v63 = vpop.f32.mrb[12].mxu1 }
 0x2af   : > { %v1014_v0 = vmul.f32 0.35355338, %v1007_v63  ;;  %v1777_v1 = vpop.f32.mrb[13].mxu1 }
 0x2b0   : > { %v1010_v2 = vpop.f32.mrb[14].mxu1 }
 0x2b1   : > { %v1015_v3 = vmul.f32 0.35355338, %v1010_v2  ;;  %v1778_v4 = vpop.f32.mrb[15].mxu1  ;;  %v1016_v5 = vadd.f32 %v1014_v0, %v510_v32 }
 0x2b3   : > { %v1018_v6 = vsel %vm642_vm4, %v1016_v5, -inf  ;;  %v1017_v8 = vadd.f32 %v1015_v3, %v511_v36 }
 0x2b4   : > { %1019 = vmax.xlane.f32.xlu0 %v1018_v6 }
 0x2b5   : > { %v1021_v11 = vsel %vm642_vm4, %v1017_v8, -inf }
 0x2b6   : > { %1022 = vmax.xlane.f32.xlu1 %v1021_v11 }
 0x329   : > { %v645_v12 = vpop.xlane.xlu1 %644 }
 0x32a   : > { %v649_v13 = vsub.f32 %v640_v39, %v645_v12 }
 0x32b   : > { %v648_v14 = vpop.xlane.xlu0 %647 }
 0x32c   : > { %v651_v15 = vmul.f32 1.442695, %v649_v13  ;;  %v650_v16 = vsub.f32 %v641_v41, %v648_v14 }
 0x32e   : > { %1929 = vpow2.f32 %v651_v15  ;;  %v653_v17 = vmul.f32 1.442695, %v650_v16 }
 0x330   : > { %1931 = vpow2.f32 %v653_v17 }
 0x331   : > { %v770_v18 = vpop.xlane.xlu0 %769 }
 0x332   : > { %v774_v20 = vsub.f32 %v766_v49, %v770_v18 }
 0x333   : > { %v773_v28 = vpop.xlane.xlu1 %772 }
 0x334   : > { %v776_v21 = vmul.f32 1.442695, %v774_v20  ;;  %v775_v29 = vsub.f32 %v767_v51, %v773_v28 }
 0x336   : > { %1933 = vpow2.f32 %v776_v21  ;;  %v778_v32 = vmul.f32 1.442695, %v775_v29 }
 0x338   : > { %v1930_v22 = vpop.eup %1929  ;;  %1935 = vpow2.f32 %v778_v32 }
 0x339   : > { %v655_v23 = vsel %vm642_vm4, %v1930_v22, 0.0  ;;  %v895_v31 = vpop.xlane.xlu0 %894 }
 0x33a   : > { %v1932_v24 = vpop.eup %1931  ;;  %656 = vadd.xlane.f32.xlu0 %v655_v23  ;;  %v899_v35 = vsub.f32 %v891_v59, %v895_v31  ;;  %v1921_v31 = vld [vmem:[%s2336_s29] sm:$0xff]  }
 0x33b   : > { %v658_v25 = vsel %vm642_vm4, %v1932_v24, 0.0  ;;  %v898_v30 = vpop.xlane.xlu1 %897  ;;  %1786 = vmatpush3.bf16.msra.mxu1 %v1921_v31  ;;  %v1669_v31 = vld [vmem:[%s2351_s18 + $0x2] ss:$0 sm:$0xff] }
 0x33c   : > { %659 = vadd.xlane.f32.xlu1 %v658_v25  ;;  %v900_v33 = vsub.f32 %v892_v61, %v898_v30  ;;  %v901_v39 = vmul.f32 1.442695, %v899_v35  ;;  %1787 = vmatprep.subr.bf16.mxu1 %v2122_v7 }
 0x33e   : > { %v903_v37 = vmul.f32 1.442695, %v900_v33 }
 0x340   : > { %v2412_v26 = vpop.eup %1933  ;;  %1937 = vpow2.f32 %v903_v37 }
 0x341   : > { %v780_v27 = vsel %vm642_vm4, %v2412_v26, 0.0  ;;  %v1020_v36 = vpop.xlane.xlu0 %1019  ;;  %1939 = vpow2.f32 %v901_v39 }
 0x342   : > { %781 = vadd.xlane.f32.xlu0 %v780_v27  ;;  %v1024_v40 = vsub.f32 %v1016_v5, %v1020_v36  ;;  %v1936_v43 = vpop.eup %1935  ;;  %v1922_v36 = vld [vmem:[%s2336_s29 + $0x8] sm:$0xff]  }
 0x343   : > { %v1023_v34 = vpop.xlane.xlu1 %1022  ;;  %v783_v44 = vsel %vm642_vm4, %v1936_v43, 0.0  ;;  %1788 = vmatpush3.bf16.msra.mxu1 %v1922_v36 }
 0x344   : > { %v1025_v38 = vsub.f32 %v1017_v8, %v1023_v34  ;;  %v1026_v42 = vmul.f32 1.442695, %v1024_v40  ;;  %1801 = vmatprep.subr.bf16.mxu1 %v2122_v7 }
 0x346   : > { %v1028_v41 = vmul.f32 1.442695, %v1025_v38 }
 0x348   : > { %1941 = vpow2.f32 %v1028_v41 }
 0x349   : > { %1943 = vpow2.f32 %v1026_v42 }
 0x34a   : > { %v1938_v45 = vpop.eup %1937 }
 0x34b   : > { %v1940_v46 = vpop.eup %1939  ;;  %v908_v47 = vsel %vm642_vm4, %v1938_v45, 0.0 }
 0x34c   : > { %v905_v49 = vsel %vm642_vm4, %v1940_v46, 0.0 }
 0x34d   : > { %791 = vrot.lane.b32.xlu1 %v2372_v19, %s2131_s30 }
 0x352   : > { %v2420_v48 = vpop.eup %1941 }
 0x353   : > { %v1944_v50 = vpop.eup %1943  ;;  %v1033_v51 = vsel %vm642_vm4, %v2420_v48, 0.0 }
 0x354   : > { %v1030_v52 = vsel %vm642_vm4, %v1944_v50, 0.0 }
 0x358   : > { %666 = vrot.lane.b32.xlu0 %v2372_v19, %s2132_s12 }
 0x371   : > { %784 = vadd.xlane.f32.xlu1 %v783_v44 }
 0x375   : > { %909 = vadd.xlane.f32.xlu1 %v908_v47 }
 0x377   : > { %906 = vadd.xlane.f32.xlu0 %v905_v49 }
 0x379   : > { %1034 = vadd.xlane.f32.xlu1 %v1033_v51 }
 0x37b   : > { %1031 = vadd.xlane.f32.xlu0 %v1030_v52 }
 0x38a   : > { %916 = vrot.lane.b32.xlu1 %v2372_v19, %s2133_s19 }
 0x391   : > { %1041 = vrot.lane.b32.xlu0 %v2372_v19, %s2134_s24 }
 0x3c7   : > { %v657_v53 = vpop.xlane.xlu0 %656 }
 0x3c8   : > { %1945 = vrcp.f32 %v657_v53 }
 0x3c9   : > { %v660_v54 = vpop.xlane.xlu1 %659 }
 0x3ca   : > { %1947 = vrcp.f32 %v660_v54 }
 0x3cd   : > { %v792_v62 = vpop.permute.xlu1 %791 }
 0x3cf   : > { %v782_v55 = vpop.xlane.xlu0 %781 }
 0x3d0   : > { %1949 = vrcp.f32 %v782_v55 }
 0x3d2   : > { %v1946_v56 = vpop.eup %1945 }
 0x3d3   : > { %v667_v57 = vpop.permute.xlu0 %666  ;;  %v663_v59 = vmul.f32 %v1946_v56, %v1930_v22 }
 0x3d4   : > { %v1948_v58 = vpop.eup %1947  ;;  %1744 = vmatpush3.bf16.msra.mxu0 %v667_v57 }
 0x3d5   : > { %v664_v60 = vmul.f32 %v1948_v58, %v1932_v24  ;;  %1755 = vmatprep.subr.bf16.mxu0 %v2122_v7 }
 0x3d7   : > { %v665_v61 = vpack.c.bf16 %v664_v60, %v663_v59 }
 0x3d9   : > { %1746 = vmatmul.mubr.msk.bf16.vlgmr.msra.gmra.mrb[4].mxu0 %vm642_vm4, %v665_v61  ;;  %v1665_v61 = vld [vmem:[%s2351_s18 + $0x1] ss:$0 sm:$0xff] }
 0x3da   : > { %1756 = vmatpush3.bf16.msra.mxu0 %v792_v62  ;;  %1757 = vmatprep.mubr.msk.bf16.mxu0 %vm2123_vm1, %v2122_v7  ;;  %v1950_v1 = vpop.eup %1949 }
 0x3db   : > { %1767 = vmatprep.subr.bf16.mxu0 %v2122_v7  ;;  %v788_v5 = vmul.f32 %v1950_v1, %v2412_v26 }
 0x3fe   : > { %v785_v19 = vpop.xlane.xlu1 %784 }
 0x3ff   : > { %1951 = vrcp.f32 %v785_v19 }
 0x402   : > { %v910_v63 = vpop.xlane.xlu1 %909 }
 0x403   : > { %1953 = vrcp.f32 %v910_v63 }
 0x404   : > { %v907_v0 = vpop.xlane.xlu0 %906 }
 0x405   : > { %1955 = vrcp.f32 %v907_v0 }
 0x406   : > { %v1035_v2 = vpop.xlane.xlu1 %1034 }
 0x408   : > { %v1032_v3 = vpop.xlane.xlu0 %1031 }
 0x409   : > { %v1952_v4 = vpop.eup %1951  ;;  %1957 = vrcp.f32 %v1032_v3 }
 0x40a   : > { %v789_v6 = vmul.f32 %v1952_v4, %v1936_v43  ;;  %1959 = vrcp.f32 %v1035_v2  ;;  %v917_v12 = vpop.permute.xlu1 %916 }
 0x40c   : > { %v790_v8 = vpack.c.bf16 %v789_v6, %v788_v5  ;;  %v1042_v18 = vpop.permute.xlu0 %1041 }
 0x40d   : > { %v1954_v11 = vpop.eup %1953 }
 0x40e   : > { %1758 = vmatmul.mubr.msk.bf16.vlgmr.msra.gmra.mrb[8].mxu0 %vm642_vm4, %v790_v8  ;;  %v914_v15 = vmul.f32 %v1954_v11, %v1938_v45 }
 0x40f   : > { %v1956_v13 = vpop.eup %1955  ;;  %1768 = vmatpush3.bf16.msra.mxu0 %v917_v12  ;;  %1769 = vmatprep.mubr.msk.bf16.mxu0 %vm2123_vm1, %v2122_v7 }
 0x410   : > { %v913_v14 = vmul.f32 %v1956_v13, %v1940_v46  ;;  %1779 = vmatprep.subr.bf16.mxu0 %v2122_v7 }
 0x412   : > { %v915_v16 = vpack.c.bf16 %v914_v15, %v913_v14 }
 0x413   : > { %v1958_v17 = vpop.eup %1957 }
 0x414   : > { %v1960_v20 = vpop.eup %1959  ;;  %v1038_v21 = vmul.f32 %v1958_v17, %v1944_v50 }
 0x415   : > { %v1039_v22 = vmul.f32 %v1960_v20, %v2420_v48  ;;  %v1924_v20 = vld [vmem:[%s2341_s17 + $0x8] sm:$0xff]  }
 0x416   : > { %1770 = vmatmul.mubr.msk.bf16.vlgmr.msra.gmra.mrb[12].mxu0 %vm642_vm4, %v915_v16 }
 0x417   : > { %1780 = vmatpush3.bf16.msra.mxu0 %v1042_v18  ;;  %1781 = vmatprep.mubr.msk.bf16.mxu0 %vm2123_vm1, %v2122_v7  ;;  %v1040_v23 = vpack.c.bf16 %v1039_v22, %v1038_v21  ;;  %v1923_v18 = vld [vmem:[%s2341_s17] sm:$0xff]   ;;  %v1926_v22 = vld [vmem:[%s2346_s20 + $0x8] sm:$0xff]  }
 0x418   : > { %1793 = vmatprep.subr.bf16.mxu0 %v2122_v7  ;;  %v1925_v21 = vld [vmem:[%s2346_s20] sm:$0xff]  }
 0x41e   : > { %1782 = vmatmul.mubr.msk.bf16.vlgmr.msra.gmra.mrb[16].mxu0 %vm642_vm4, %v1040_v23 }
 0x41f   : > { %1797 = vmatprep.mubr.msk.bf16.mxu0 %vm2123_vm1, %v2122_v7  ;;  %1794 = vmatpush3.bf16.msra.mxu0 %v1923_v18  ;;  %v1682_v18 = vld [vmem:[%s2351_s18 + $0x7] ss:$0 sm:$0xff] }
 0x420   : > { %1795 = vmatprep.subr.bf16.mxu0 %v2122_v7 }
 0x423   : > { %1796 = vmatpush3.bf16.msra.mxu0 %v1924_v20 }
 0x4ac   : > { %v706_v24 = vpop.f32.mrb[4].mxu0 }
 0x4ad   : > { %v1747_v25 = vpop.f32.mrb[5].mxu0 }
 0x4ae   : > { %v709_v26 = vpop.f32.mrb[6].mxu0 }
 0x4af   : > { %v1748_v27 = vpop.f32.mrb[7].mxu0 }
 0x4e1   : > { %v831_v28 = vpop.f32.mrb[8].mxu0 }
 0x4e2   : > { %v1759_v29 = vpop.f32.mrb[9].mxu0 }
 0x4e3   : > { %v834_v30 = vpop.f32.mrb[10].mxu0 }
 0x4e4   : > { %v1904_v32 = vpack.i.bf16 %v834_v30, %v831_v28  ;;  %v1760_v33 = vpop.f32.mrb[11].mxu0 }
 0x4e6   : > { %1905 = vrot.lane.b32.xlu1 %v1904_v32, %s2135_s25 }
 0x4e9   : > { %v956_v34 = vpop.f32.mrb[12].mxu0 }
 0x4ea   : > { %v1771_v35 = vpop.f32.mrb[13].mxu0 }
 0x4eb   : > { %v959_v37 = vpop.f32.mrb[14].mxu0  ;;  %v1670_v35 = vld [vmem:[%s2351_s18 + $0x3] ss:$0 sm:$0xff] }
 0x4ec   : > { %v1909_v38 = vpack.i.bf16 %v959_v37, %v956_v34  ;;  %v1772_v39 = vpop.f32.mrb[15].mxu0 }
 0x4ee   : > { %1910 = vrot.lane.b32.xlu0 %v1909_v38, %s2136_s10 }
 0x4f1   : > { %v1081_v40 = vpop.f32.mrb[16].mxu0 }
 0x4f2   : > { %v1783_v41 = vpop.f32.mrb[17].mxu0 }
 0x4f3   : > { %v1084_v42 = vpop.f32.mrb[18].mxu0  ;;  %v1928_v41 = vld [vmem:[%s2346_s20 + $0x18] sm:$0xff]  }
 0x4f4   : > { %v1914_v43 = vpack.i.bf16 %v1084_v42, %v1081_v40  ;;  %v1784_v44 = vpop.f32.mrb[19].mxu0  ;;  %v1927_v40 = vld [vmem:[%s2346_s20 + $0x10] sm:$0xff]   ;;  %v1671_v42 = vld [vmem:[%s2351_s18 + $0x4] ss:$0 sm:$0xff] }
 0x4f6   : > { %1915 = vrot.lane.b32.xlu1 %v1914_v43, %s2137_s14 }
 0x558   : > { %v1906_v45 = vpop.permute.xlu1 %1905 }
 0x559   : > { %v1908_v47 = vunpack.i.h.bf16 %v1906_v45  ;;  %v1907_v48 = vunpack.i.l.bf16 %v1906_v45 }
 0x55b   : > { %v1113_v52 = vsel %vm590_vm3, %v709_v26, %v1908_v47  ;;  %v1112_v53 = vsel %vm590_vm3, %v706_v24, %v1907_v48 }
 0x560   : > { %v1911_v46 = vpop.permute.xlu0 %1910 }
 0x561   : > { %v1913_v49 = vunpack.i.h.bf16 %v1911_v46  ;;  %v1912_v50 = vunpack.i.l.bf16 %v1911_v46 }
 0x563   : > { %v1115_v56 = vsel %vm642_vm4, %v1113_v52, %v1913_v49  ;;  %v1114_v57 = vsel %vm642_vm4, %v1112_v53, %v1912_v50  ;;  %v1675_v52 = vld [vmem:[%s2351_s18 + $0x5] ss:$0 sm:$0xff] }
 0x568   : > { %v1916_v51 = vpop.permute.xlu1 %1915 }
 0x569   : > { %v1918_v54 = vunpack.i.h.bf16 %v1916_v51  ;;  %v1917_v55 = vunpack.i.l.bf16 %v1916_v51 }
 0x56b   : > { %v1118_v58 = vsel %vm1116_vm5, %v1115_v56, %v1918_v54  ;;  %v1117_v59 = vsel %vm1116_vm5, %v1114_v57, %v1917_v55 }
 0x56c   : > { %v1119_v60 = vpack.c.bf16 %v1118_v58, %v1117_v59 }
 0x56e   : > { %1790 = vmatmul.mubr.msk.bf16.vlgmr.msra.gmra.mrb[16].mxu1 %vm541_vm2, %v1119_v60 }
 0x56f   : > { %1809 = vmatprep.mubr.msk.bf16.mxu1 %vm2123_vm1, %v2122_v7  ;;  %1802 = vmatpush3.bf16.msra.mxu1 %v1925_v21 }
 0x570   : > { %1803 = vmatprep.subr.bf16.mxu1 %v2122_v7 }
 0x573   : > { %1804 = vmatpush3.bf16.msra.mxu1 %v1926_v22 }
 0x574   : > { %1805 = vmatprep.subr.bf16.mxu1 %v2122_v7 }
 0x577   : > { %1806 = vmatpush3.bf16.msra.mxu1 %v1927_v40 }
 0x578   : > { %1807 = vmatprep.subr.bf16.mxu1 %v2122_v7 }
 0x57b   : > { %1808 = vmatpush3.bf16.msra.mxu1 %v1928_v41 }
 0x641   : > { %v1177_v62 = vpop.f32.mrb[16].mxu1 }
 0x642   : > { %v1178_v19 = vadd.f32 %v1665_v61, %v1177_v62  ;;  %v1791_v63 = vpop.f32.mrb[17].mxu1 }
 0x643   : > { %v1180_v0 = vpop.f32.mrb[18].mxu1 }
 0x644   : > { %v1181_v1 = vadd.f32 %v1665_v61, %v1180_v0  ;;  %v1792_v2 = vpop.f32.mrb[19].mxu1  ;;  %v1184_v3 = vadd.f32 %v1178_v19, %v2358_v9 }
 0x646   : > { %v1186_v4 = vsel %vm541_vm2, %v1184_v3, 0.0  ;;  %v1185_v5 = vadd.f32 %v1181_v1, %v2360_v10 }
 0x647   : > { %1187 = vadd.xlane.f32.xlu0 %v1186_v4 }
 0x648   : > { %v1189_v6 = vsel %vm541_vm2, %v1185_v5, 0.0 }
 0x649   : > { %1190 = vadd.xlane.f32.xlu1 %v1189_v6 }
 0x6d4   : > { %v1188_v8 = vpop.xlane.xlu0 %1187 }
 0x6d5   : > { %v1193_v11 = vmul.f32 0.03125, %v1188_v8 }
 0x6d6   : > { %v1191_v12 = vpop.xlane.xlu1 %1190 }
 0x6d7   : > { %v1195_v13 = vsub.f32 %v1184_v3, %v1193_v11  ;;  %v1194_v14 = vmul.f32 0.03125, %v1191_v12 }
 0x6d9   : > { %v1196_v15 = vsub.f32 %v1185_v5, %v1194_v14  ;;  %v1197_v16 = vmul.f32 %v1195_v13, %v1195_v13 }
 0x6db   : > { %v1199_v9 = vsel %vm541_vm2, %v1197_v16, 0.0  ;;  %v1198_v17 = vmul.f32 %v1196_v15, %v1196_v15 }
 0x6dc   : > { %1200 = vadd.xlane.f32.xlu0 %v1199_v9  ;;  %v1681_v9 = vld [vmem:[%s2351_s18 + $0x6] ss:$0 sm:$0xff] }
 0x6dd   : > { %v1202_v10 = vsel %vm541_vm2, %v1198_v17, 0.0 }
 0x6e0   : > { %1203 = vadd.xlane.f32.xlu0 %v1202_v10 }
 0x769   : > { %v1201_v23 = vpop.xlane.xlu0 %1200 }
 0x76a   : > { %v1205_v24 = vmul.f32 0.03125, %v1201_v23 }
 0x76c   : > { %v1207_v25 = vadd.f32 1e-05, %v1205_v24 }
 0x76d   : > { %v1204_v26 = vpop.xlane.xlu0 %1203 }
 0x76e   : > { %1961 = vrsqrt.f32 %v1207_v25  ;;  %v1206_v27 = vmul.f32 0.03125, %v1204_v26  ;;  %v1969_v25 = vld [vmem:[%s2547_s8] sm:$0xff] (!%p1683_p10)   ;;  %v2138_v26 = vmov (!%p1683_p10), 0.0  }
 0x76f   : > { %1813 = vmatprep.subr.bf16.mxu0 (!%p1683_p10), %v2138_v26 }
 0x770   : > { %v1208_v28 = vadd.f32 1e-05, %v1206_v27  ;;  %v1970_v27 = vld [vmem:[%s2547_s8 + $0x8] sm:$0xff] (!%p1683_p10)  }
 0x772   : > { %1963 = vrsqrt.f32 %v1208_v28 }
 0x778   : > { %v1962_v29 = vpop.eup %1961 }
 0x779   : > { %v1211_v30 = vmul.f32 %v1962_v29, %v1195_v13  ;;  %v1684_v29 = vld [vmem:[%s2548_s9] ss:$0 sm:$0xff] (!%p1683_p10) }
 0x77b   : > { %v1217_v33 = vmul.f32 %v1669_v31, %v1211_v30 }
 0x77c   : > { %v1964_v32 = vpop.eup %1963 }
 0x77d   : > { %v1212_v34 = vmul.f32 %v1964_v32, %v1196_v15  ;;  %v1223_v37 = vadd.f32 %v1670_v35, %v1217_v33 }
 0x77f   : > { %v1218_v36 = vmul.f32 %v1669_v31, %v1212_v34 }
 0x781   : > { %v1224_v38 = vadd.f32 %v1670_v35, %v1218_v36 }
 0x783   : > { %v1225_v39 = vpack.c.bf16 %v1224_v38, %v1223_v37 }
 0x785   : > { %1798 = vmatmul.mubr.msk.bf16.vlgmr.msra.gmra.mrb[20].mxu0 %vm541_vm2, %v1225_v39 }
 0x786   : > { %1814 = vmatpush3.bf16.msra.mxu0 (!%p1683_p10), %v1969_v25  ;;  %1817 = vmatprep.mubr.msk.bf16.mxu0 (!%p1683_p10), %vm2139_vm7, %v2138_v26 }
 0x787   : > { %1815 = vmatprep.subr.bf16.mxu0 (!%p1683_p10), %v2138_v26 }
 0x78a   : > { %1816 = vmatpush3.bf16.msra.mxu0 (!%p1683_p10), %v1970_v27 }
 0x858   : > { %v1283_v43 = vpop.f32.mrb[20].mxu0 }
 0x859   : > { %v1284_v44 = vadd.f32 %v1671_v42, %v1283_v43  ;;  %v1799_v45 = vpop.f32.mrb[21].mxu0 }
 0x85a   : > { %v1286_v46 = vpop.f32.mrb[22].mxu0 }
 0x85b   : > { %v1287_v47 = vadd.f32 %v1671_v42, %v1286_v46  ;;  %v1800_v48 = vpop.f32.mrb[23].mxu0  ;;  %v1290_v49 = vmax.f32 %v1284_v44, 0.0 }
 0x85d   : > { %v1291_v50 = vmax.f32 %v1287_v47, 0.0 }
 0x85f   : > { %v1292_v51 = vpack.c.bf16 %v1291_v50, %v1290_v49 }
 0x861   : > { %1810 = vmatmul.mubr.msk.bf16.vlgmr.msra.gmra.mrb[20].mxu1 %vm1329_vm6, %v1292_v51 }
 0x934   : > { %v1367_v53 = vpop.f32.mrb[20].mxu1 }
 0x935   : > { %v1368_v54 = vadd.f32 %v1675_v52, %v1367_v53  ;;  %v1811_v55 = vpop.f32.mrb[21].mxu1 }
 0x936   : > { %v1370_v56 = vpop.f32.mrb[22].mxu1 }
 0x937   : > { %v1371_v7 = vadd.f32 %v1675_v52, %v1370_v56  ;;  %v1812_v57 = vpop.f32.mrb[23].mxu1  ;;  %v1374_v58 = vadd.f32 %v1368_v54, %v1223_v37 }
 0x939   : > { %v1376_v59 = vsel %vm541_vm2, %v1374_v58, 0.0  ;;  %v1375_v60 = vadd.f32 %v1371_v7, %v1224_v38 }
 0x93a   : > { %1377 = vadd.xlane.f32.xlu1 %v1376_v59 }
 0x93b   : > { %v1379_v61 = vsel %vm541_vm2, %v1375_v60, 0.0 }
 0x93c   : > { %1380 = vadd.xlane.f32.xlu0 %v1379_v61 }
 0x9c7   : > { %v1378_v62 = vpop.xlane.xlu1 %1377 }
 0x9c8   : > { %v1382_v19 = vmul.f32 0.03125, %v1378_v62 }
 0x9c9   : > { %v1381_v63 = vpop.xlane.xlu0 %1380 }
 0x9ca   : > { %v1384_v0 = vsub.f32 %v1374_v58, %v1382_v19  ;;  %v1383_v1 = vmul.f32 0.03125, %v1381_v63 }
 0x9cc   : > { %v1385_v2 = vsub.f32 %v1375_v60, %v1383_v1  ;;  %v1386_v3 = vmul.f32 %v1384_v0, %v1384_v0 }
 0x9ce   : > { %v1388_v4 = vsel %vm541_vm2, %v1386_v3, 0.0  ;;  %v1387_v5 = vmul.f32 %v1385_v2, %v1385_v2 }
 0x9cf   : > { %1389 = vadd.xlane.f32.xlu1 %v1388_v4 }
 0x9d0   : > { %v1391_v6 = vsel %vm541_vm2, %v1387_v5, 0.0 }
 0x9d1   : > { %1392 = vadd.xlane.f32.xlu0 %v1391_v6 }
 0xa5c   : > { %v1390_v8 = vpop.xlane.xlu1 %1389 }
 0xa5d   : > { %v1394_v11 = vmul.f32 0.03125, %v1390_v8 }
 0xa5e   : > { %v1393_v12 = vpop.xlane.xlu0 %1392 }
 0xa5f   : > { %v1396_v13 = vadd.f32 1e-05, %v1394_v11  ;;  %v1395_v14 = vmul.f32 0.03125, %v1393_v12 }
 0xa61   : > { %1965 = vrsqrt.f32 %v1396_v13  ;;  %v1397_v15 = vadd.f32 1e-05, %v1395_v14 }
 0xa63   : > { %1967 = vrsqrt.f32 %v1397_v15 }
 0xa6b   : > { %v1966_v16 = vpop.eup %1965 }
 0xa6c   : > { %v1400_v17 = vmul.f32 %v1966_v16, %v1384_v0 }
 0xa6d   : > { %v1968_v10 = vpop.eup %1967 }
 0xa6e   : > { %v1406_v20 = vmul.f32 %v1681_v9, %v1400_v17  ;;  %v1401_v21 = vmul.f32 %v1968_v10, %v1385_v2  ;;  %1419 = sbr.rel (%p1683_p10) target bundleno = 2895 (0xb4f), region = 80 }
 0xa70   : > { %v1412_v22 = vadd.f32 %v1682_v18, %v1406_v20  ;;  %v1407_v23 = vmul.f32 %v1681_v9, %v1401_v21 }
 0xa72   : > { %1414 = vst.msk [vmem:[#allocation2] sm:$0xff] %vm541_vm2, %v1412_v22  ;;  %v1413_v24 = vadd.f32 %v1682_v18, %v1407_v23 }
 0xa74   : > { %1415 = vst.msk [vmem:[#allocation2 + $0x8] sm:$0xff] %vm541_vm2, %v1413_v24  ;;  %v1420_v28 = vpack.c.bf16 (!%p1683_p10), %v1413_v24, %v1412_v22 }
 0xa76   : > { %1818 = vmatmul.mubr.msk.bf16.vlgmr.msra.gmra.mrb[0].mxu0 %vm541_vm2, %v1420_v28 }
 0xb49   : > { %v1481_v30 = vpop.f32.mrb[0].mxu0 }
 0xb4a   : > { %v1482_v31 = vadd.f32 %v1684_v29, %v1481_v30  ;;  %v1819_v32 = vpop.f32.mrb[1].mxu0 }
 0xb4b   : > { %v1484_v33 = vpop.f32.mrb[2].mxu0 }
 0xb4c   : > { %1488 = vst.msk [vmem:[#allocation9] sm:$0xff] %vm642_vm4, %v1482_v31  ;;  %v1485_v34 = vadd.f32 %v1684_v29, %v1484_v33  ;;  %v1820_v35 = vpop.f32.mrb[3].mxu0 }
 0xb4e   : > { %1489 = vst.msk [vmem:[#allocation9 + $0x8] sm:$0xff] %vm642_vm4, %v1485_v34 }
 0xb4f PF: > { %s2565_s11 = sadd.s32 4294967295, %s2115_s15   ;;  %s2140_s27 = smov [#allocation9]  }
 0xb50   : > { %p2503_p11 = scmp.eq.s32.totalorder %s2565_s11, 1  ;;  %s1499_s16 = sshll.u32 %s2140_s27, 4  ;;  %s1500_s16 = int_to_ptr.vmem [resolvable:$true] %s1499_s16 }
 0xb51   : > { %s2055_s23 = scalar_lea.vmem %s1500_s16, 256  ;;  %p2062_p0 = scmp.lt.s32.totalorder %s1500_s16, %s1500_s16 }
 0xb52   : > { %p2056_p12 = scmp.ne.s32.totalorder %s1500_s16, %s2055_s23  ;;  %p2063_p1 = scmp.lt.s32.totalorder %s2055_s23, %s2055_s23 }
 0xb54   : > { %p2057_p13 = pnand %p2056_p12, %p2503_p11  ;;  %p2064_p4 = por %p2063_p1, %p2062_p0 }
 0xb56   : > { %p2058_p6 = pneg %p2057_p13 }
 0xb58   : > { %p2065_p7 = pnand %p2064_p4, %p2058_p6 }
 0xb5a   : > { %2068 = shalt.err (!%p2065_p7)
}
 0xb5b   : > { %s2567_s12 = sld [smem:[#allocation14_spill]] }
 0xb61   : > { %s2069_s19 = scalar_lea.hbm %s2567_s12, 256 }
 0xb62   : > { %p2070_p9 = scmp.ne.s32.totalorder %s2567_s12, %s2069_s19  ;;  %p2075_p2 = scmp.lt.u32.totalorder %s2069_s19, %s2567_s12 }
 0xb64   : > { %p2071_p3 = pnand %p2070_p9, %p2503_p11 }
 0xb66   : > { %p2072_p8 = pneg %p2071_p3 }
 0xb68   : > { %p2077_p5 = pnand %p2075_p2, %p2072_p8 }
 0xb6a   : > { %2080 = shalt.err (!%p2077_p5)
}
 0xb6b   : > { %s2141_s17 = smov 128  }
 0xb6c   : > { %1834 = dma.vmem_to_hbm [thread:$0]  (%p2503_p11), %s1500_s16, 256, %s2567_s12, [#allocation5], %s2141_s17, %s2141_s17, %s2135_s25  }
 0xb6d   : > { %2102 = dma.done.wait (%p2503_p11), [#allocation5], 256  }
 0xb6e   : > { %2104 = vsyncadd (%p2503_p11), [#allocation5], 4294967040 }
 0xb6f PF: > { %s23_s15 = sadd.s32 1, %s2115_s15   ;;  %s2568_s13 = sld [smem:[#allocation13_spill]] }
 0xb70   : > { %p20_p10 = scmp.ge.s32.totalorder %s23_s15, 4   ;;  %s2569_s14 = smov %s2571_s22 }
 0xb72   :  { %22 = sbr.rel (!%p20_p10) target bundleno = 6 (0x6), region = 122 }
 0xb79   :  { %1515 = vsyncpa [#allocation4], 1 }
 0xb7a   :  { %1517 = vsyncpa [#allocation4 + $0x1], 1 }
 0xb7b   :  { %1518 = vsyncpa [#allocation7], 1 }
 0xb7c   :  { %1519 = vsyncpa [#allocation5], 1 }
 0xb7d   :  { %1521 = vsyncpa [#allocation5 + $0x1], 1 }

</bundles_post_ra>
